<compile_context>
chip_gen: v7x
topology: tpu7x:2x2x1
jax: 0.10.0
libtpu: 0.0.40
codegen_flags: <defaults>
</compile_context>

<pallas_src>
import math

import jax
import jax.numpy as jnp
from jax.experimental import pallas as pl
from jax.experimental.pallas import tpu as pltpu


_VMEM = pl.BlockSpec(memory_space=pltpu.MemorySpace.VMEM)

_LAYER_KEYS = (
    "wpackT", "we1rT", "be1T",
    "we2T", "be2T", "we3T", "be3T",
    "wc1T", "bc1T", "wc2T",
    "bv1T", "wv2T", "bv2T",
    "wn1aT", "bn1T", "wn2T", "bn2T",
    "gammaT", "betaT",
)


# ----------------------------------------------------------------------------
# Fused Pallas kernel: all Clof_GCL layers + global add-pool + prediction MLP
# ----------------------------------------------------------------------------
def clofnet_fused_kernel(
    # graph data
    h0T_ref, coordT_ref, row_le_ref, col_le_ref, row_se_ref, batch_se_ref,
    inv_deg_ref,
    # stacked per-layer parameters (leading dim = num_layers)
    wpackT_ref, we1rT_ref, be1T_ref,
    we2T_ref, be2T_ref, we3T_ref, be3T_ref,
    wc1T_ref, bc1T_ref, wc2T_ref,
    bv1T_ref, wv2T_ref, bv2T_ref,
    wn1aT_ref, bn1T_ref, wn2T_ref, bn2T_ref,
    gammaT_ref, betaT_ref,
    # prediction head
    wp1T_ref, bp1T_ref, wp2T_ref, bp2T_ref,
    # output: (out_dim, num_graphs)
    out_ref,
):
    f32 = jnp.float32
    bf16 = jnp.bfloat16
    D, N = h0T_ref.shape
    E = row_le_ref.shape[1]
    L = wpackT_ref.shape[0]
    B = out_ref.shape[1]

    def mm(a, b):
        # bf16 MXU matmul with float32 accumulation
        return jnp.dot(a.astype(bf16), b.astype(bf16),
                       preferred_element_type=f32)

    # ---- one-hot incidence matrices: built once (bf16), reused by all layers.
    #      (N, E) orientation for node->edge gathers, (E, N) for scatters.
    iota_NE = jax.lax.broadcasted_iota(jnp.int32, (N, E), 0)
    row_NE = (iota_NE == row_le_ref[...]).astype(f32).astype(bf16)
    col_NE = (iota_NE == col_le_ref[...]).astype(f32).astype(bf16)
    iota_EN = jax.lax.broadcasted_iota(jnp.int32, (E, N), 1)
    row_EN = (iota_EN == row_se_ref[...]).astype(f32).astype(bf16)
    iota_NB = jax.lax.broadcasted_iota(jnp.int32, (N, B), 1)
    pool_NB = (iota_NB == batch_se_ref[...]).astype(f32).astype(bf16)

    inv_deg = inv_deg_ref[...]                       # (1, N) = 1/clamp(deg, 1)

    hT = h0T_ref[...]                                # (D, N) float32
    cT = coordT_ref[...]                             # (3, N) float32

    # TODO(synk): for large batched graphs (E*N one-hots exceeding VMEM, e.g.
    # v7x's 64 MiB) the edge axis must be tiled with segment-sum accumulators
    # and the second v7x TensorCore used; at these sizes everything is resident.
    for l in range(L):                               # unrolled: L small & static
        # ---- packed node-side projections: [we1s; we1t; wv1; wn1h]^T @ h
        hproj = mm(wpackT_ref[l], hT)                # (4D, N)
        hsT = hproj[0 * D:1 * D]                     # edge-mlp "source" part
        htT = hproj[1 * D:2 * D]                     # edge-mlp "target" part
        hvT = hproj[2 * D:3 * D]                     # coord_mlp_vel hidden (pre-bias)
        hnT = hproj[3 * D:4 * D]                     # node-mlp h part (pre-bias)

        # ---- gathers node -> edge via one-hot matmuls
        hs_rowT = mm(hsT, row_NE)                    # (D, E) == (h[row] @ we1s)^T
        ht_colT = mm(htT, col_NE)                    # (D, E) == (h[col] @ we1t)^T
        cr = mm(cT, row_NE)                          # (3, E) coord[row]^T
        cc = mm(cT, col_NE)                          # (3, E) coord[col]^T

        # ---- coord2localframe (norm_diff=False), lane-dense (1, E) rows
        cdx = cr[0:1] - cc[0:1]
        cdy = cr[1:2] - cc[1:2]
        cdz = cr[2:3] - cc[2:3]
        radial = cdx * cdx + cdy * cdy + cdz * cdz   # (1, E)
        # coord_cross = coord[row] x coord[col]
        crx = cr[1:2] * cc[2:3] - cr[2:3] * cc[1:2]
        cry = cr[2:3] * cc[0:1] - cr[0:1] * cc[2:3]
        crz = cr[0:1] * cc[1:2] - cr[1:2] * cc[0:1]
        # coord_vertical = coord_diff x coord_cross
        cvx = cdy * crz - cdz * cry
        cvy = cdz * crx - cdx * crz
        cvz = cdx * cry - cdy * crx

        # ---- edge MLP: 3 x (Linear + ReLU), activations feature-major (D, E)
        m = hs_rowT + ht_colT + we1rT_ref[l] * radial + be1T_ref[l]
        m = jnp.maximum(m, 0.0)
        m = jnp.maximum(mm(we2T_ref[l], m) + be2T_ref[l], 0.0)
        edge_featT = jnp.maximum(mm(we3T_ref[l], m) + be3T_ref[l], 0.0)

        # ---- coord MLP -> local-frame coefficients, directly (3, E)
        cm = jnp.maximum(mm(wc1T_ref[l], edge_featT) + bc1T_ref[l], 0.0)
        coffT = mm(wc2T_ref[l], cm)                  # (3, E)
        c0, c1, c2 = coffT[0:1], coffT[1:2], coffT[2:3]
        tx = jnp.clip(cdx * c0 + crx * c1 + cvx * c2, -100.0, 100.0)
        ty = jnp.clip(cdy * c0 + cry * c1 + cvy * c2, -100.0, 100.0)
        tz = jnp.clip(cdz * c0 + crz * c1 + cvz * c2, -100.0, 100.0)
        transT = jnp.concatenate([tx, ty, tz], axis=0)   # (3, E)

        # ---- unsorted_segment_mean(trans, row): scatter-add then * 1/deg
        agg_mean = mm(transT, row_EN) * inv_deg      # (3, N)

        # ---- coord_mlp_vel(h): (1, N), broadcast over xyz
        velT = mm(wv2T_ref[l], jnp.maximum(hvT + bv1T_ref[l], 0.0)) + bv2T_ref[l]

        cT = cT + agg_mean + velT                    # coords_weight = 1.0

        # ---- node model: agg = segment_sum(edge_feat, row); node_mlp([h, agg])
        agg_eT = mm(edge_featT, row_EN)              # (D, N)
        nT = jnp.maximum(hnT + mm(wn1aT_ref[l], agg_eT) + bn1T_ref[l], 0.0)
        node_outT = mm(wn2T_ref[l], nT) + bn2T_ref[l]

        # recurrent node residual + Clof_GCL "residue + h"  ->  2*h + node_out
        h2 = 2.0 * hT + node_outT
        # LayerNorm over the feature (sublane) axis, eps = 1e-5
        mu = jnp.mean(h2, axis=0, keepdims=True)
        var = jnp.mean((h2 - mu) * (h2 - mu), axis=0, keepdims=True)
        h_ln = (h2 - mu) * jax.lax.rsqrt(var + 1e-5) * gammaT_ref[l] + betaT_ref[l]

        # ClofNetModel outer residual (residual=True)
        hT = hT + h_ln

    # ---- global add-pool + prediction MLP (feature-major; output (out_dim, B))
    pooled = mm(hT, pool_NB)                         # (D, B)
    x = jnp.maximum(mm(wp1T_ref[...], pooled) + bp1T_ref[...], 0.0)
    out_ref[...] = mm(wp2T_ref[...], x) + bp2T_ref[...]


# ----------------------------------------------------------------------------
# Host-side packing of PyTorch-shaped parameters into the kernel layout
# ----------------------------------------------------------------------------
def _pack_one_layer(p):
    (we1s, we1t, we1r, be1, we2, be2, we3, be3,
     wc1, bc1, wc2, wv1, bv1, wv2, bv2,
     wn1h, wn1a, bn1, wn2, bn2, gamma, beta) = p
    f32, bf16 = jnp.float32, jnp.bfloat16
    return {
        "wpackT": jnp.concatenate(
            [we1s.T, we1t.T, wv1.T, wn1h.T], axis=0).astype(bf16),  # (4D, D)
        "we1rT": we1r.T.astype(f32),                                # (D, 1)
        "be1T": be1.T.astype(f32),
        "we2T": we2.T.astype(bf16), "be2T": be2.T.astype(f32),
        "we3T": we3.T.astype(bf16), "be3T": be3.T.astype(f32),
        "wc1T": wc1.T.astype(bf16), "bc1T": bc1.T.astype(f32),
        "wc2T": wc2.T.astype(bf16),                                 # (3, D)
        "bv1T": bv1.T.astype(f32),
        "wv2T": wv2.T.astype(bf16),                                 # (1, D)
        "bv2T": bv2.T.astype(f32),                                  # (1, 1)
        "wn1aT": wn1a.T.astype(bf16), "bn1T": bn1.T.astype(f32),
        "wn2T": wn2.T.astype(bf16), "bn2T": bn2.T.astype(f32),
        "gammaT": gamma.T.astype(f32), "betaT": beta.T.astype(f32),
    }


def pack_layer_params(layer_params_list):
    per = [_pack_one_layer(p) for p in layer_params_list]
    return tuple(jnp.stack([d[k] for d in per], axis=0) for k in _LAYER_KEYS)


def pack_pred_params(pred_params):
    wp1, bp1, wp2, bp2 = pred_params
    return (wp1.T.astype(jnp.bfloat16), bp1.T.astype(jnp.float32),
            wp2.T.astype(jnp.bfloat16), bp2.T.astype(jnp.float32))


# ----------------------------------------------------------------------------
# Full ClofNetModel forward (one pallas_call)
# ----------------------------------------------------------------------------
def clofnet_forward(atoms, pos, row, col, batch_ids, emb_table,
                    layer_params_list, pred_params, num_graphs, out_dim):
    N = atoms.shape[0]
    E = row.shape[0]

    # plain-JAX glue: embedding lookup, layout reshapes, 1/degree precompute
    h0T = jnp.take(emb_table, atoms, axis=0).T.astype(jnp.float32)   # (D, N)
    coordT = pos.T.astype(jnp.float32)                               # (3, N)
    row_le = row.reshape(1, E).astype(jnp.int32)                     # lane-dense
    col_le = col.reshape(1, E).astype(jnp.int32)
    row_se = row.reshape(E, 1).astype(jnp.int32)                     # sublane form
    batch_se = batch_ids.reshape(N, 1).astype(jnp.int32)
    deg = jnp.zeros((N,), jnp.float32).at[row.reshape(-1)].add(1.0)
    inv_deg = (1.0 / jnp.maximum(deg, 1.0)).reshape(1, N)            # clamp(min=1)

    args = ((h0T, coordT, row_le, col_le, row_se, batch_se, inv_deg)
            + pack_layer_params(layer_params_list)
            + pack_pred_params(pred_params))

    outT = pl.pallas_call(
        clofnet_fused_kernel,
        out_shape=jax.ShapeDtypeStruct((out_dim, num_graphs), jnp.float32),
        in_specs=[_VMEM] * len(args),
        out_specs=_VMEM,
    )(*args)
    return outT.T                                                    # (B, out_dim)


# ----------------------------------------------------------------------------
# Deterministic parameter initialization (mirrors PyTorch module shapes)
# ----------------------------------------------------------------------------
def _linear(key, fan_in, fan_out, bias=True):
    kw, kb = jax.random.split(key)
    bound = 1.0 / math.sqrt(fan_in)
    w = jax.random.uniform(kw, (fan_in, fan_out), jnp.float32, -bound, bound)
    if not bias:
        return (w,)
    b = jax.random.uniform(kb, (1, fan_out), jnp.float32, -bound, bound)
    return (w, b)


def init_clof_gcl_params(key, D):
    ks = jax.random.split(key, 10)
    # edge_mlp: Linear(2D+1, D), Linear(D, D), Linear(D, D)
    we1_full, be1 = _linear(ks[0], 2 * D + 1, D)
    we1s, we1t, we1r = we1_full[:D], we1_full[D:2 * D], we1_full[2 * D:]
    we2, be2 = _linear(ks[1], D, D)
    we3, be3 = _linear(ks[2], D, D)
    # coord_mlp: Linear(D, D), Linear(D, 3, bias=False, xavier gain=0.001)
    wc1, bc1 = _linear(ks[3], D, D)
    xb = 0.001 * math.sqrt(6.0 / (D + 3))
    wc2 = jax.random.uniform(ks[4], (D, 3), jnp.float32, -xb, xb)
    # coord_mlp_vel: Linear(D, D), Linear(D, 1)
    wv1, bv1 = _linear(ks[5], D, D)
    wv2, bv2 = _linear(ks[6], D, 1)
    # node_mlp: Linear(2D, D), Linear(D, D)
    wn1_full, bn1 = _linear(ks[7], 2 * D, D)
    wn1h, wn1a = wn1_full[:D], wn1_full[D:]
    wn2, bn2 = _linear(ks[8], D, D)
    # LayerNorm(D)
    gamma = jnp.ones((1, D), jnp.float32)
    beta = jnp.zeros((1, D), jnp.float32)
    return (we1s, we1t, we1r, be1, we2, be2, we3, be3,
            wc1, bc1, wc2,
            wv1, bv1, wv2, bv2,
            wn1h, wn1a, bn1, wn2, bn2,
            gamma, beta)


def init_pred_params(key, D, out_dim):
    k1, k2 = jax.random.split(key)
    wp1, bp1 = _linear(k1, D, D)
    wp2, bp2 = _linear(k2, D, out_dim)
    return (wp1, bp1, wp2, bp2)


# ----------------------------------------------------------------------------
if __name__ == "__main__":
    key = jax.random.PRNGKey(0)

    emb_dim = 32
    in_dim = 4          # atom vocabulary
    out_dim = 1
    num_layers = 2
    num_graphs = 2
    nodes_per_graph = 4
    N = num_graphs * nodes_per_graph

    k_emb, k_atoms, k_pos, k_layers, k_pred = jax.random.split(key, 5)

    emb_table = jax.random.normal(k_emb, (in_dim, emb_dim), jnp.float32)
    layer_keys = jax.random.split(k_layers, num_layers)
    layer_params_list = [init_clof_gcl_params(k, emb_dim) for k in layer_keys]
    pred_params = init_pred_params(k_pred, emb_dim, out_dim)

    # graph batch: fully-connected (no self loops) within each graph
    rows, cols, batch = [], [], []
    for g in range(num_graphs):
        base = g * nodes_per_graph
        for i in range(nodes_per_graph):
            batch.append(g)
            for j in range(nodes_per_graph):
                if i != j:
                    rows.append(base + i)
                    cols.append(base + j)
    row = jnp.array(rows, dtype=jnp.int32)            # (E,)
    col = jnp.array(cols, dtype=jnp.int32)            # (E,)
    batch_ids = jnp.array(batch, dtype=jnp.int32)     # (N,)

    atoms = jax.random.randint(k_atoms, (N,), 0, in_dim, dtype=jnp.int32)
    pos = jax.random.normal(k_pos, (N, 3), jnp.float32)

    out = clofnet_forward(atoms, pos, row, col, batch_ids, emb_table,
                          layer_params_list, pred_params, num_graphs, out_dim)
    out = jax.block_until_ready(out)
    assert out.shape == (num_graphs, out_dim)
    assert bool(jnp.all(jnp.isfinite(out)))
    print("KERNEL_OK")
</pallas_src>

<mosaic_0001>
module attributes {stable_mosaic.version = 11 : i64} {
  func.func @clofnet_fused_kernel(%arg0: memref<32x8xf32, #tpu.memory_space<vmem>>, %arg1: memref<3x8xf32, #tpu.memory_space<vmem>>, %arg2: memref<1x24xi32, #tpu.memory_space<vmem>>, %arg3: memref<1x24xi32, #tpu.memory_space<vmem>>, %arg4: memref<24x1xi32, #tpu.memory_space<vmem>>, %arg5: memref<8x1xi32, #tpu.memory_space<vmem>>, %arg6: memref<1x8xf32, #tpu.memory_space<vmem>>, %arg7: memref<2x128x32xbf16, #tpu.memory_space<vmem>>, %arg8: memref<2x32x1xf32, #tpu.memory_space<vmem>>, %arg9: memref<2x32x1xf32, #tpu.memory_space<vmem>>, %arg10: memref<2x32x32xbf16, #tpu.memory_space<vmem>>, %arg11: memref<2x32x1xf32, #tpu.memory_space<vmem>>, %arg12: memref<2x32x32xbf16, #tpu.memory_space<vmem>>, %arg13: memref<2x32x1xf32, #tpu.memory_space<vmem>>, %arg14: memref<2x32x32xbf16, #tpu.memory_space<vmem>>, %arg15: memref<2x32x1xf32, #tpu.memory_space<vmem>>, %arg16: memref<2x3x32xbf16, #tpu.memory_space<vmem>>, %arg17: memref<2x32x1xf32, #tpu.memory_space<vmem>>, %arg18: memref<2x1x32xbf16, #tpu.memory_space<vmem>>, %arg19: memref<2x1x1xf32, #tpu.memory_space<vmem>>, %arg20: memref<2x32x32xbf16, #tpu.memory_space<vmem>>, %arg21: memref<2x32x1xf32, #tpu.memory_space<vmem>>, %arg22: memref<2x32x32xbf16, #tpu.memory_space<vmem>>, %arg23: memref<2x32x1xf32, #tpu.memory_space<vmem>>, %arg24: memref<2x32x1xf32, #tpu.memory_space<vmem>>, %arg25: memref<2x32x1xf32, #tpu.memory_space<vmem>>, %arg26: memref<32x32xbf16, #tpu.memory_space<vmem>>, %arg27: memref<32x1xf32, #tpu.memory_space<vmem>>, %arg28: memref<1x32xbf16, #tpu.memory_space<vmem>>, %arg29: memref<1x1xf32, #tpu.memory_space<vmem>>, %arg30: memref<1x2xf32, #tpu.memory_space<vmem>>) attributes {dimension_semantics = [], scalar_prefetch = 0 : i64, scratch_operands = 0 : i64, tpu.core_type = #tpu.core_type<tc>} {
    %0 = tpu.iota {dimensions = array<i32: 0>} : vector<8x24xi32>
    %c0 = arith.constant 0 : index
    %c0_0 = arith.constant 0 : index
    %1 = vector.load %arg2[%c0, %c0_0] : memref<1x24xi32, #tpu.memory_space<vmem>>, vector<1x24xi32>
    %2 = vector.broadcast %1 : vector<1x24xi32> to vector<8x24xi32>
    %3 = arith.cmpi eq, %0, %2 : vector<8x24xi32>
    %4 = arith.extui %3 : vector<8x24xi1> to vector<8x24xi32>
    %5 = arith.sitofp %4 : vector<8x24xi32> to vector<8x24xf32>
    %6 = arith.truncf %5 : vector<8x24xf32> to vector<8x24xbf16>
    %c0_1 = arith.constant 0 : index
    %c0_2 = arith.constant 0 : index
    %7 = vector.load %arg3[%c0_1, %c0_2] : memref<1x24xi32, #tpu.memory_space<vmem>>, vector<1x24xi32>
    %8 = vector.broadcast %7 : vector<1x24xi32> to vector<8x24xi32>
    %9 = arith.cmpi eq, %0, %8 : vector<8x24xi32>
    %10 = arith.extui %9 : vector<8x24xi1> to vector<8x24xi32>
    %11 = arith.sitofp %10 : vector<8x24xi32> to vector<8x24xf32>
    %12 = arith.truncf %11 : vector<8x24xf32> to vector<8x24xbf16>
    %13 = tpu.iota {dimensions = array<i32: 1>} : vector<24x8xi32>
    %c0_3 = arith.constant 0 : index
    %c0_4 = arith.constant 0 : index
    %14 = vector.load %arg4[%c0_3, %c0_4] : memref<24x1xi32, #tpu.memory_space<vmem>>, vector<24x1xi32>
    %15 = vector.broadcast %14 : vector<24x1xi32> to vector<24x8xi32>
    %16 = arith.cmpi eq, %13, %15 : vector<24x8xi32>
    %17 = arith.extui %16 : vector<24x8xi1> to vector<24x8xi32>
    %18 = arith.sitofp %17 : vector<24x8xi32> to vector<24x8xf32>
    %19 = arith.truncf %18 : vector<24x8xf32> to vector<24x8xbf16>
    %20 = tpu.iota {dimensions = array<i32: 1>} : vector<8x2xi32>
    %c0_5 = arith.constant 0 : index
    %c0_6 = arith.constant 0 : index
    %21 = vector.load %arg5[%c0_5, %c0_6] : memref<8x1xi32, #tpu.memory_space<vmem>>, vector<8x1xi32>
    %22 = vector.broadcast %21 : vector<8x1xi32> to vector<8x2xi32>
    %23 = arith.cmpi eq, %20, %22 : vector<8x2xi32>
    %24 = arith.extui %23 : vector<8x2xi1> to vector<8x2xi32>
    %25 = arith.sitofp %24 : vector<8x2xi32> to vector<8x2xf32>
    %26 = arith.truncf %25 : vector<8x2xf32> to vector<8x2xbf16>
    %c0_7 = arith.constant 0 : index
    %c0_8 = arith.constant 0 : index
    %27 = vector.load %arg6[%c0_7, %c0_8] : memref<1x8xf32, #tpu.memory_space<vmem>>, vector<1x8xf32>
    %c0_9 = arith.constant 0 : index
    %c0_10 = arith.constant 0 : index
    %28 = vector.load %arg0[%c0_9, %c0_10] : memref<32x8xf32, #tpu.memory_space<vmem>>, vector<32x8xf32>
    %c0_11 = arith.constant 0 : index
    %c0_12 = arith.constant 0 : index
    %29 = vector.load %arg1[%c0_11, %c0_12] : memref<3x8xf32, #tpu.memory_space<vmem>>, vector<3x8xf32>
    %c0_13 = arith.constant 0 : index
    %c0_14 = arith.constant 0 : index
    %c0_15 = arith.constant 0 : index
    %30 = vector.load %arg7[%c0_13, %c0_14, %c0_15] : memref<2x128x32xbf16, #tpu.memory_space<vmem>>, vector<1x128x32xbf16>
    %31 = vector.shape_cast %30 : vector<1x128x32xbf16> to vector<128x32xbf16>
    %32 = arith.truncf %28 : vector<32x8xf32> to vector<32x8xbf16>
    %cst = arith.constant dense<0.000000e+00> : vector<128x8xf32>
    %33 = tpu.matmul %31, %32, %cst {dimension_numbers = #tpu.dot_dimension_numbers<[1], [0], [0], [1], [0, 0, 1, 1], [], []>} : vector<128x32xbf16>, vector<32x8xbf16>, vector<128x8xf32> -> vector<128x8xf32>
    %34 = vector.extract_strided_slice %33 {offsets = [0, 0], sizes = [32, 8], strides = [1, 1]} : vector<128x8xf32> to vector<32x8xf32>
    %35 = vector.extract_strided_slice %33 {offsets = [32, 0], sizes = [32, 8], strides = [1, 1]} : vector<128x8xf32> to vector<32x8xf32>
    %36 = vector.extract_strided_slice %33 {offsets = [64, 0], sizes = [32, 8], strides = [1, 1]} : vector<128x8xf32> to vector<32x8xf32>
    %37 = vector.extract_strided_slice %33 {offsets = [96, 0], sizes = [32, 8], strides = [1, 1]} : vector<128x8xf32> to vector<32x8xf32>
    %38 = arith.truncf %34 : vector<32x8xf32> to vector<32x8xbf16>
    %cst_16 = arith.constant dense<0.000000e+00> : vector<32x24xf32>
    %39 = tpu.matmul %38, %6, %cst_16 {dimension_numbers = #tpu.dot_dimension_numbers<[1], [0], [0], [1], [0, 0, 1, 1], [], []>} : vector<32x8xbf16>, vector<8x24xbf16>, vector<32x24xf32> -> vector<32x24xf32>
    %40 = arith.truncf %35 : vector<32x8xf32> to vector<32x8xbf16>
    %cst_17 = arith.constant dense<0.000000e+00> : vector<32x24xf32>
    %41 = tpu.matmul %40, %12, %cst_17 {dimension_numbers = #tpu.dot_dimension_numbers<[1], [0], [0], [1], [0, 0, 1, 1], [], []>} : vector<32x8xbf16>, vector<8x24xbf16>, vector<32x24xf32> -> vector<32x24xf32>
    %42 = arith.truncf %29 : vector<3x8xf32> to vector<3x8xbf16>
    %cst_18 = arith.constant dense<0.000000e+00> : vector<3x24xf32>
    %43 = tpu.matmul %42, %6, %cst_18 {dimension_numbers = #tpu.dot_dimension_numbers<[1], [0], [0], [1], [0, 0, 1, 1], [], []>} : vector<3x8xbf16>, vector<8x24xbf16>, vector<3x24xf32> -> vector<3x24xf32>
    %44 = arith.truncf %29 : vector<3x8xf32> to vector<3x8xbf16>
    %cst_19 = arith.constant dense<0.000000e+00> : vector<3x24xf32>
    %45 = tpu.matmul %44, %12, %cst_19 {dimension_numbers = #tpu.dot_dimension_numbers<[1], [0], [0], [1], [0, 0, 1, 1], [], []>} : vector<3x8xbf16>, vector<8x24xbf16>, vector<3x24xf32> -> vector<3x24xf32>
    %46 = vector.extract_strided_slice %43 {offsets = [0, 0], sizes = [1, 24], strides = [1, 1]} : vector<3x24xf32> to vector<1x24xf32>
    %47 = vector.extract_strided_slice %45 {offsets = [0, 0], sizes = [1, 24], strides = [1, 1]} : vector<3x24xf32> to vector<1x24xf32>
    %48 = arith.subf %46, %47 : vector<1x24xf32>
    %49 = vector.extract_strided_slice %43 {offsets = [1, 0], sizes = [1, 24], strides = [1, 1]} : vector<3x24xf32> to vector<1x24xf32>
    %50 = vector.extract_strided_slice %45 {offsets = [1, 0], sizes = [1, 24], strides = [1, 1]} : vector<3x24xf32> to vector<1x24xf32>
    %51 = arith.subf %49, %50 : vector<1x24xf32>
    %52 = vector.extract_strided_slice %43 {offsets = [2, 0], sizes = [1, 24], strides = [1, 1]} : vector<3x24xf32> to vector<1x24xf32>
    %53 = vector.extract_strided_slice %45 {offsets = [2, 0], sizes = [1, 24], strides = [1, 1]} : vector<3x24xf32> to vector<1x24xf32>
    %54 = arith.subf %52, %53 : vector<1x24xf32>
    %55 = arith.mulf %48, %48 : vector<1x24xf32>
    %56 = arith.mulf %51, %51 : vector<1x24xf32>
    %57 = arith.addf %55, %56 : vector<1x24xf32>
    %58 = arith.mulf %54, %54 : vector<1x24xf32>
    %59 = arith.addf %57, %58 : vector<1x24xf32>
    %60 = vector.extract_strided_slice %43 {offsets = [1, 0], sizes = [1, 24], strides = [1, 1]} : vector<3x24xf32> to vector<1x24xf32>
    %61 = vector.extract_strided_slice %45 {offsets = [2, 0], sizes = [1, 24], strides = [1, 1]} : vector<3x24xf32> to vector<1x24xf32>
    %62 = arith.mulf %60, %61 : vector<1x24xf32>
    %63 = vector.extract_strided_slice %43 {offsets = [2, 0], sizes = [1, 24], strides = [1, 1]} : vector<3x24xf32> to vector<1x24xf32>
    %64 = vector.extract_strided_slice %45 {offsets = [1, 0], sizes = [1, 24], strides = [1, 1]} : vector<3x24xf32> to vector<1x24xf32>
    %65 = arith.mulf %63, %64 : vector<1x24xf32>
    %66 = arith.subf %62, %65 : vector<1x24xf32>
    %67 = vector.extract_strided_slice %43 {offsets = [2, 0], sizes = [1, 24], strides = [1, 1]} : vector<3x24xf32> to vector<1x24xf32>
    %68 = vector.extract_strided_slice %45 {offsets = [0, 0], sizes = [1, 24], strides = [1, 1]} : vector<3x24xf32> to vector<1x24xf32>
    %69 = arith.mulf %67, %68 : vector<1x24xf32>
    %70 = vector.extract_strided_slice %43 {offsets = [0, 0], sizes = [1, 24], strides = [1, 1]} : vector<3x24xf32> to vector<1x24xf32>
    %71 = vector.extract_strided_slice %45 {offsets = [2, 0], sizes = [1, 24], strides = [1, 1]} : vector<3x24xf32> to vector<1x24xf32>
    %72 = arith.mulf %70, %71 : vector<1x24xf32>
    %73 = arith.subf %69, %72 : vector<1x24xf32>
    %74 = vector.extract_strided_slice %43 {offsets = [0, 0], sizes = [1, 24], strides = [1, 1]} : vector<3x24xf32> to vector<1x24xf32>
    %75 = vector.extract_strided_slice %45 {offsets = [1, 0], sizes = [1, 24], strides = [1, 1]} : vector<3x24xf32> to vector<1x24xf32>
    %76 = arith.mulf %74, %75 : vector<1x24xf32>
    %77 = vector.extract_strided_slice %43 {offsets = [1, 0], sizes = [1, 24], strides = [1, 1]} : vector<3x24xf32> to vector<1x24xf32>
    %78 = vector.extract_strided_slice %45 {offsets = [0, 0], sizes = [1, 24], strides = [1, 1]} : vector<3x24xf32> to vector<1x24xf32>
    %79 = arith.mulf %77, %78 : vector<1x24xf32>
    %80 = arith.subf %76, %79 : vector<1x24xf32>
    %81 = arith.mulf %51, %80 : vector<1x24xf32>
    %82 = arith.mulf %54, %73 : vector<1x24xf32>
    %83 = arith.subf %81, %82 : vector<1x24xf32>
    %84 = arith.mulf %54, %66 : vector<1x24xf32>
    %85 = arith.mulf %48, %80 : vector<1x24xf32>
    %86 = arith.subf %84, %85 : vector<1x24xf32>
    %87 = arith.mulf %48, %73 : vector<1x24xf32>
    %88 = arith.mulf %51, %66 : vector<1x24xf32>
    %89 = arith.subf %87, %88 : vector<1x24xf32>
    %90 = arith.addf %39, %41 : vector<32x24xf32>
    %c0_20 = arith.constant 0 : index
    %c0_21 = arith.constant 0 : index
    %c0_22 = arith.constant 0 : index
    %91 = vector.load %arg8[%c0_20, %c0_21, %c0_22] : memref<2x32x1xf32, #tpu.memory_space<vmem>>, vector<1x32x1xf32>
    %92 = vector.shape_cast %91 : vector<1x32x1xf32> to vector<32x1xf32>
    %93 = vector.broadcast %92 : vector<32x1xf32> to vector<32x24xf32>
    %94 = vector.broadcast %59 : vector<1x24xf32> to vector<32x24xf32>
    %95 = arith.mulf %93, %94 : vector<32x24xf32>
    %96 = arith.addf %90, %95 : vector<32x24xf32>
    %c0_23 = arith.constant 0 : index
    %c0_24 = arith.constant 0 : index
    %c0_25 = arith.constant 0 : index
    %97 = vector.load %arg9[%c0_23, %c0_24, %c0_25] : memref<2x32x1xf32, #tpu.memory_space<vmem>>, vector<1x32x1xf32>
    %98 = vector.shape_cast %97 : vector<1x32x1xf32> to vector<32x1xf32>
    %99 = vector.broadcast %98 : vector<32x1xf32> to vector<32x24xf32>
    %100 = arith.addf %96, %99 : vector<32x24xf32>
    %cst_26 = arith.constant 0.000000e+00 : f32
    %101 = vector.broadcast %cst_26 : f32 to vector<32x24xf32>
    %102 = arith.maximumf %100, %101 : vector<32x24xf32>
    %c0_27 = arith.constant 0 : index
    %c0_28 = arith.constant 0 : index
    %c0_29 = arith.constant 0 : index
    %103 = vector.load %arg10[%c0_27, %c0_28, %c0_29] : memref<2x32x32xbf16, #tpu.memory_space<vmem>>, vector<1x32x32xbf16>
    %104 = vector.shape_cast %103 : vector<1x32x32xbf16> to vector<32x32xbf16>
    %105 = arith.truncf %102 : vector<32x24xf32> to vector<32x24xbf16>
    %cst_30 = arith.constant dense<0.000000e+00> : vector<32x24xf32>
    %106 = tpu.matmul %104, %105, %cst_30 {dimension_numbers = #tpu.dot_dimension_numbers<[1], [0], [0], [1], [0, 0, 1, 1], [], []>} : vector<32x32xbf16>, vector<32x24xbf16>, vector<32x24xf32> -> vector<32x24xf32>
    %c0_31 = arith.constant 0 : index
    %c0_32 = arith.constant 0 : index
    %c0_33 = arith.constant 0 : index
    %107 = vector.load %arg11[%c0_31, %c0_32, %c0_33] : memref<2x32x1xf32, #tpu.memory_space<vmem>>, vector<1x32x1xf32>
    %108 = vector.shape_cast %107 : vector<1x32x1xf32> to vector<32x1xf32>
    %109 = vector.broadcast %108 : vector<32x1xf32> to vector<32x24xf32>
    %110 = arith.addf %106, %109 : vector<32x24xf32>
    %cst_34 = arith.constant 0.000000e+00 : f32
    %111 = vector.broadcast %cst_34 : f32 to vector<32x24xf32>
    %112 = arith.maximumf %110, %111 : vector<32x24xf32>
    %c0_35 = arith.constant 0 : index
    %c0_36 = arith.constant 0 : index
    %c0_37 = arith.constant 0 : index
    %113 = vector.load %arg12[%c0_35, %c0_36, %c0_37] : memref<2x32x32xbf16, #tpu.memory_space<vmem>>, vector<1x32x32xbf16>
    %114 = vector.shape_cast %113 : vector<1x32x32xbf16> to vector<32x32xbf16>
    %115 = arith.truncf %112 : vector<32x24xf32> to vector<32x24xbf16>
    %cst_38 = arith.constant dense<0.000000e+00> : vector<32x24xf32>
    %116 = tpu.matmul %114, %115, %cst_38 {dimension_numbers = #tpu.dot_dimension_numbers<[1], [0], [0], [1], [0, 0, 1, 1], [], []>} : vector<32x32xbf16>, vector<32x24xbf16>, vector<32x24xf32> -> vector<32x24xf32>
    %c0_39 = arith.constant 0 : index
    %c0_40 = arith.constant 0 : index
    %c0_41 = arith.constant 0 : index
    %117 = vector.load %arg13[%c0_39, %c0_40, %c0_41] : memref<2x32x1xf32, #tpu.memory_space<vmem>>, vector<1x32x1xf32>
    %118 = vector.shape_cast %117 : vector<1x32x1xf32> to vector<32x1xf32>
    %119 = vector.broadcast %118 : vector<32x1xf32> to vector<32x24xf32>
    %120 = arith.addf %116, %119 : vector<32x24xf32>
    %cst_42 = arith.constant 0.000000e+00 : f32
    %121 = vector.broadcast %cst_42 : f32 to vector<32x24xf32>
    %122 = arith.maximumf %120, %121 : vector<32x24xf32>
    %c0_43 = arith.constant 0 : index
    %c0_44 = arith.constant 0 : index
    %c0_45 = arith.constant 0 : index
    %123 = vector.load %arg14[%c0_43, %c0_44, %c0_45] : memref<2x32x32xbf16, #tpu.memory_space<vmem>>, vector<1x32x32xbf16>
    %124 = vector.shape_cast %123 : vector<1x32x32xbf16> to vector<32x32xbf16>
    %125 = arith.truncf %122 : vector<32x24xf32> to vector<32x24xbf16>
    %cst_46 = arith.constant dense<0.000000e+00> : vector<32x24xf32>
    %126 = tpu.matmul %124, %125, %cst_46 {dimension_numbers = #tpu.dot_dimension_numbers<[1], [0], [0], [1], [0, 0, 1, 1], [], []>} : vector<32x32xbf16>, vector<32x24xbf16>, vector<32x24xf32> -> vector<32x24xf32>
    %c0_47 = arith.constant 0 : index
    %c0_48 = arith.constant 0 : index
    %c0_49 = arith.constant 0 : index
    %127 = vector.load %arg15[%c0_47, %c0_48, %c0_49] : memref<2x32x1xf32, #tpu.memory_space<vmem>>, vector<1x32x1xf32>
    %128 = vector.shape_cast %127 : vector<1x32x1xf32> to vector<32x1xf32>
    %129 = vector.broadcast %128 : vector<32x1xf32> to vector<32x24xf32>
    %130 = arith.addf %126, %129 : vector<32x24xf32>
    %cst_50 = arith.constant 0.000000e+00 : f32
    %131 = vector.broadcast %cst_50 : f32 to vector<32x24xf32>
    %132 = arith.maximumf %130, %131 : vector<32x24xf32>
    %c0_51 = arith.constant 0 : index
    %c0_52 = arith.constant 0 : index
    %c0_53 = arith.constant 0 : index
    %133 = vector.load %arg16[%c0_51, %c0_52, %c0_53] : memref<2x3x32xbf16, #tpu.memory_space<vmem>>, vector<1x3x32xbf16>
    %134 = vector.shape_cast %133 : vector<1x3x32xbf16> to vector<3x32xbf16>
    %135 = arith.truncf %132 : vector<32x24xf32> to vector<32x24xbf16>
    %cst_54 = arith.constant dense<0.000000e+00> : vector<3x24xf32>
    %136 = tpu.matmul %134, %135, %cst_54 {dimension_numbers = #tpu.dot_dimension_numbers<[1], [0], [0], [1], [0, 0, 1, 1], [], []>} : vector<3x32xbf16>, vector<32x24xbf16>, vector<3x24xf32> -> vector<3x24xf32>
    %137 = vector.extract_strided_slice %136 {offsets = [0, 0], sizes = [1, 24], strides = [1, 1]} : vector<3x24xf32> to vector<1x24xf32>
    %138 = vector.extract_strided_slice %136 {offsets = [1, 0], sizes = [1, 24], strides = [1, 1]} : vector<3x24xf32> to vector<1x24xf32>
    %139 = vector.extract_strided_slice %136 {offsets = [2, 0], sizes = [1, 24], strides = [1, 1]} : vector<3x24xf32> to vector<1x24xf32>
    %140 = arith.mulf %48, %137 : vector<1x24xf32>
    %141 = arith.mulf %66, %138 : vector<1x24xf32>
    %142 = arith.addf %140, %141 : vector<1x24xf32>
    %143 = arith.mulf %83, %139 : vector<1x24xf32>
    %144 = arith.addf %142, %143 : vector<1x24xf32>
    %cst_55 = arith.constant -1.000000e+02 : f32
    %cst_56 = arith.constant 1.000000e+02 : f32
    %145 = vector.broadcast %cst_55 : f32 to vector<1x24xf32>
    %146 = arith.maximumf %145, %144 : vector<1x24xf32>
    %147 = vector.broadcast %cst_56 : f32 to vector<1x24xf32>
    %148 = arith.minimumf %147, %146 : vector<1x24xf32>
    %149 = arith.mulf %51, %137 : vector<1x24xf32>
    %150 = arith.mulf %73, %138 : vector<1x24xf32>
    %151 = arith.addf %149, %150 : vector<1x24xf32>
    %152 = arith.mulf %86, %139 : vector<1x24xf32>
    %153 = arith.addf %151, %152 : vector<1x24xf32>
    %cst_57 = arith.constant -1.000000e+02 : f32
    %cst_58 = arith.constant 1.000000e+02 : f32
    %154 = vector.broadcast %cst_57 : f32 to vector<1x24xf32>
    %155 = arith.maximumf %154, %153 : vector<1x24xf32>
    %156 = vector.broadcast %cst_58 : f32 to vector<1x24xf32>
    %157 = arith.minimumf %156, %155 : vector<1x24xf32>
    %158 = arith.mulf %54, %137 : vector<1x24xf32>
    %159 = arith.mulf %80, %138 : vector<1x24xf32>
    %160 = arith.addf %158, %159 : vector<1x24xf32>
    %161 = arith.mulf %89, %139 : vector<1x24xf32>
    %162 = arith.addf %160, %161 : vector<1x24xf32>
    %cst_59 = arith.constant -1.000000e+02 : f32
    %cst_60 = arith.constant 1.000000e+02 : f32
    %163 = vector.broadcast %cst_59 : f32 to vector<1x24xf32>
    %164 = arith.maximumf %163, %162 : vector<1x24xf32>
    %165 = vector.broadcast %cst_60 : f32 to vector<1x24xf32>
    %166 = arith.minimumf %165, %164 : vector<1x24xf32>
    %167 = tpu.concatenate %148, %157, %166 in 0 : vector<1x24xf32>, vector<1x24xf32>, vector<1x24xf32> -> vector<3x24xf32>
    %168 = arith.truncf %167 : vector<3x24xf32> to vector<3x24xbf16>
    %cst_61 = arith.constant dense<0.000000e+00> : vector<3x8xf32>
    %169 = tpu.matmul %168, %19, %cst_61 {dimension_numbers = #tpu.dot_dimension_numbers<[1], [0], [0], [1], [0, 0, 1, 1], [], []>} : vector<3x24xbf16>, vector<24x8xbf16>, vector<3x8xf32> -> vector<3x8xf32>
    %170 = vector.broadcast %27 : vector<1x8xf32> to vector<3x8xf32>
    %171 = arith.mulf %169, %170 : vector<3x8xf32>
    %c0_62 = arith.constant 0 : index
    %c0_63 = arith.constant 0 : index
    %c0_64 = arith.constant 0 : index
    %172 = vector.load %arg18[%c0_62, %c0_63, %c0_64] : memref<2x1x32xbf16, #tpu.memory_space<vmem>>, vector<1x1x32xbf16>
    %173 = vector.shape_cast %172 : vector<1x1x32xbf16> to vector<1x32xbf16>
    %c0_65 = arith.constant 0 : index
    %c0_66 = arith.constant 0 : index
    %c0_67 = arith.constant 0 : index
    %174 = vector.load %arg17[%c0_65, %c0_66, %c0_67] : memref<2x32x1xf32, #tpu.memory_space<vmem>>, vector<1x32x1xf32>
    %175 = vector.shape_cast %174 : vector<1x32x1xf32> to vector<32x1xf32>
    %176 = vector.broadcast %175 : vector<32x1xf32> to vector<32x8xf32>
    %177 = arith.addf %36, %176 : vector<32x8xf32>
    %cst_68 = arith.constant 0.000000e+00 : f32
    %178 = vector.broadcast %cst_68 : f32 to vector<32x8xf32>
    %179 = arith.maximumf %177, %178 : vector<32x8xf32>
    %180 = arith.truncf %179 : vector<32x8xf32> to vector<32x8xbf16>
    %cst_69 = arith.constant dense<0.000000e+00> : vector<1x8xf32>
    %181 = tpu.matmul %173, %180, %cst_69 {dimension_numbers = #tpu.dot_dimension_numbers<[1], [0], [0], [1], [0, 0, 1, 1], [], []>} : vector<1x32xbf16>, vector<32x8xbf16>, vector<1x8xf32> -> vector<1x8xf32>
    %c0_70 = arith.constant 0 : index
    %c0_71 = arith.constant 0 : index
    %c0_72 = arith.constant 0 : index
    %182 = vector.load %arg19[%c0_70, %c0_71, %c0_72] : memref<2x1x1xf32, #tpu.memory_space<vmem>>, vector<1x1x1xf32>
    %183 = vector.shape_cast %182 : vector<1x1x1xf32> to vector<1x1xf32>
    %184 = vector.broadcast %183 : vector<1x1xf32> to vector<1x8xf32>
    %185 = arith.addf %181, %184 : vector<1x8xf32>
    %186 = arith.addf %29, %171 : vector<3x8xf32>
    %187 = vector.broadcast %185 : vector<1x8xf32> to vector<3x8xf32>
    %188 = arith.addf %186, %187 : vector<3x8xf32>
    %189 = arith.truncf %122 : vector<32x24xf32> to vector<32x24xbf16>
    %cst_73 = arith.constant dense<0.000000e+00> : vector<32x8xf32>
    %190 = tpu.matmul %189, %19, %cst_73 {dimension_numbers = #tpu.dot_dimension_numbers<[1], [0], [0], [1], [0, 0, 1, 1], [], []>} : vector<32x24xbf16>, vector<24x8xbf16>, vector<32x8xf32> -> vector<32x8xf32>
    %c0_74 = arith.constant 0 : index
    %c0_75 = arith.constant 0 : index
    %c0_76 = arith.constant 0 : index
    %191 = vector.load %arg20[%c0_74, %c0_75, %c0_76] : memref<2x32x32xbf16, #tpu.memory_space<vmem>>, vector<1x32x32xbf16>
    %192 = vector.shape_cast %191 : vector<1x32x32xbf16> to vector<32x32xbf16>
    %193 = arith.truncf %190 : vector<32x8xf32> to vector<32x8xbf16>
    %cst_77 = arith.constant dense<0.000000e+00> : vector<32x8xf32>
    %194 = tpu.matmul %192, %193, %cst_77 {dimension_numbers = #tpu.dot_dimension_numbers<[1], [0], [0], [1], [0, 0, 1, 1], [], []>} : vector<32x32xbf16>, vector<32x8xbf16>, vector<32x8xf32> -> vector<32x8xf32>
    %195 = arith.addf %37, %194 : vector<32x8xf32>
    %c0_78 = arith.constant 0 : index
    %c0_79 = arith.constant 0 : index
    %c0_80 = arith.constant 0 : index
    %196 = vector.load %arg21[%c0_78, %c0_79, %c0_80] : memref<2x32x1xf32, #tpu.memory_space<vmem>>, vector<1x32x1xf32>
    %197 = vector.shape_cast %196 : vector<1x32x1xf32> to vector<32x1xf32>
    %198 = vector.broadcast %197 : vector<32x1xf32> to vector<32x8xf32>
    %199 = arith.addf %195, %198 : vector<32x8xf32>
    %cst_81 = arith.constant 0.000000e+00 : f32
    %200 = vector.broadcast %cst_81 : f32 to vector<32x8xf32>
    %201 = arith.maximumf %199, %200 : vector<32x8xf32>
    %c0_82 = arith.constant 0 : index
    %c0_83 = arith.constant 0 : index
    %c0_84 = arith.constant 0 : index
    %202 = vector.load %arg22[%c0_82, %c0_83, %c0_84] : memref<2x32x32xbf16, #tpu.memory_space<vmem>>, vector<1x32x32xbf16>
    %203 = vector.shape_cast %202 : vector<1x32x32xbf16> to vector<32x32xbf16>
    %204 = arith.truncf %201 : vector<32x8xf32> to vector<32x8xbf16>
    %cst_85 = arith.constant dense<0.000000e+00> : vector<32x8xf32>
    %205 = tpu.matmul %203, %204, %cst_85 {dimension_numbers = #tpu.dot_dimension_numbers<[1], [0], [0], [1], [0, 0, 1, 1], [], []>} : vector<32x32xbf16>, vector<32x8xbf16>, vector<32x8xf32> -> vector<32x8xf32>
    %c0_86 = arith.constant 0 : index
    %c0_87 = arith.constant 0 : index
    %c0_88 = arith.constant 0 : index
    %206 = vector.load %arg23[%c0_86, %c0_87, %c0_88] : memref<2x32x1xf32, #tpu.memory_space<vmem>>, vector<1x32x1xf32>
    %207 = vector.shape_cast %206 : vector<1x32x1xf32> to vector<32x1xf32>
    %208 = vector.broadcast %207 : vector<32x1xf32> to vector<32x8xf32>
    %209 = arith.addf %205, %208 : vector<32x8xf32>
    %cst_89 = arith.constant 2.000000e+00 : f32
    %210 = vector.broadcast %cst_89 : f32 to vector<32x8xf32>
    %211 = arith.mulf %210, %28 : vector<32x8xf32>
    %212 = arith.addf %211, %209 : vector<32x8xf32>
    %cst_90 = arith.constant dense<0.000000e+00> : vector<8xf32>
    %213 = vector.multi_reduction <add>, %212, %cst_90 [0] : vector<32x8xf32> to vector<8xf32>
    %214 = vector.shape_cast %213 : vector<8xf32> to vector<1x8xf32>
    %cst_91 = arith.constant 3.200000e+01 : f32
    %215 = vector.broadcast %cst_91 : f32 to vector<1x8xf32>
    %216 = arith.divf %214, %215 : vector<1x8xf32>
    %217 = vector.broadcast %216 : vector<1x8xf32> to vector<32x8xf32>
    %218 = arith.subf %212, %217 : vector<32x8xf32>
    %219 = vector.broadcast %216 : vector<1x8xf32> to vector<32x8xf32>
    %220 = arith.subf %212, %219 : vector<32x8xf32>
    %221 = arith.mulf %218, %220 : vector<32x8xf32>
    %cst_92 = arith.constant dense<0.000000e+00> : vector<8xf32>
    %222 = vector.multi_reduction <add>, %221, %cst_92 [0] : vector<32x8xf32> to vector<8xf32>
    %223 = vector.shape_cast %222 : vector<8xf32> to vector<1x8xf32>
    %cst_93 = arith.constant 3.200000e+01 : f32
    %224 = vector.broadcast %cst_93 : f32 to vector<1x8xf32>
    %225 = arith.divf %223, %224 : vector<1x8xf32>
    %226 = vector.broadcast %216 : vector<1x8xf32> to vector<32x8xf32>
    %227 = arith.subf %212, %226 : vector<32x8xf32>
    %cst_94 = arith.constant 9.99999974E-6 : f32
    %228 = vector.broadcast %cst_94 : f32 to vector<1x8xf32>
    %229 = arith.addf %225, %228 : vector<1x8xf32>
    %230 = math.rsqrt %229 : vector<1x8xf32>
    %231 = vector.broadcast %230 : vector<1x8xf32> to vector<32x8xf32>
    %232 = arith.mulf %227, %231 : vector<32x8xf32>
    %c0_95 = arith.constant 0 : index
    %c0_96 = arith.constant 0 : index
    %c0_97 = arith.constant 0 : index
    %233 = vector.load %arg24[%c0_95, %c0_96, %c0_97] : memref<2x32x1xf32, #tpu.memory_space<vmem>>, vector<1x32x1xf32>
    %234 = vector.shape_cast %233 : vector<1x32x1xf32> to vector<32x1xf32>
    %235 = vector.broadcast %234 : vector<32x1xf32> to vector<32x8xf32>
    %236 = arith.mulf %232, %235 : vector<32x8xf32>
    %c0_98 = arith.constant 0 : index
    %c0_99 = arith.constant 0 : index
    %c0_100 = arith.constant 0 : index
    %237 = vector.load %arg25[%c0_98, %c0_99, %c0_100] : memref<2x32x1xf32, #tpu.memory_space<vmem>>, vector<1x32x1xf32>
    %238 = vector.shape_cast %237 : vector<1x32x1xf32> to vector<32x1xf32>
    %239 = vector.broadcast %238 : vector<32x1xf32> to vector<32x8xf32>
    %240 = arith.addf %236, %239 : vector<32x8xf32>
    %241 = arith.addf %28, %240 : vector<32x8xf32>
    %c1 = arith.constant 1 : index
    %c0_101 = arith.constant 0 : index
    %c0_102 = arith.constant 0 : index
    %242 = vector.load %arg7[%c1, %c0_101, %c0_102] : memref<2x128x32xbf16, #tpu.memory_space<vmem>>, vector<1x128x32xbf16>
    %243 = vector.shape_cast %242 : vector<1x128x32xbf16> to vector<128x32xbf16>
    %244 = arith.truncf %241 : vector<32x8xf32> to vector<32x8xbf16>
    %cst_103 = arith.constant dense<0.000000e+00> : vector<128x8xf32>
    %245 = tpu.matmul %243, %244, %cst_103 {dimension_numbers = #tpu.dot_dimension_numbers<[1], [0], [0], [1], [0, 0, 1, 1], [], []>} : vector<128x32xbf16>, vector<32x8xbf16>, vector<128x8xf32> -> vector<128x8xf32>
    %246 = vector.extract_strided_slice %245 {offsets = [0, 0], sizes = [32, 8], strides = [1, 1]} : vector<128x8xf32> to vector<32x8xf32>
    %247 = vector.extract_strided_slice %245 {offsets = [32, 0], sizes = [32, 8], strides = [1, 1]} : vector<128x8xf32> to vector<32x8xf32>
    %248 = vector.extract_strided_slice %245 {offsets = [96, 0], sizes = [32, 8], strides = [1, 1]} : vector<128x8xf32> to vector<32x8xf32>
    %249 = arith.truncf %246 : vector<32x8xf32> to vector<32x8xbf16>
    %cst_104 = arith.constant dense<0.000000e+00> : vector<32x24xf32>
    %250 = tpu.matmul %249, %6, %cst_104 {dimension_numbers = #tpu.dot_dimension_numbers<[1], [0], [0], [1], [0, 0, 1, 1], [], []>} : vector<32x8xbf16>, vector<8x24xbf16>, vector<32x24xf32> -> vector<32x24xf32>
    %251 = arith.truncf %247 : vector<32x8xf32> to vector<32x8xbf16>
    %cst_105 = arith.constant dense<0.000000e+00> : vector<32x24xf32>
    %252 = tpu.matmul %251, %12, %cst_105 {dimension_numbers = #tpu.dot_dimension_numbers<[1], [0], [0], [1], [0, 0, 1, 1], [], []>} : vector<32x8xbf16>, vector<8x24xbf16>, vector<32x24xf32> -> vector<32x24xf32>
    %253 = arith.truncf %188 : vector<3x8xf32> to vector<3x8xbf16>
    %cst_106 = arith.constant dense<0.000000e+00> : vector<3x24xf32>
    %254 = tpu.matmul %253, %6, %cst_106 {dimension_numbers = #tpu.dot_dimension_numbers<[1], [0], [0], [1], [0, 0, 1, 1], [], []>} : vector<3x8xbf16>, vector<8x24xbf16>, vector<3x24xf32> -> vector<3x24xf32>
    %255 = arith.truncf %188 : vector<3x8xf32> to vector<3x8xbf16>
    %cst_107 = arith.constant dense<0.000000e+00> : vector<3x24xf32>
    %256 = tpu.matmul %255, %12, %cst_107 {dimension_numbers = #tpu.dot_dimension_numbers<[1], [0], [0], [1], [0, 0, 1, 1], [], []>} : vector<3x8xbf16>, vector<8x24xbf16>, vector<3x24xf32> -> vector<3x24xf32>
    %257 = vector.extract_strided_slice %254 {offsets = [0, 0], sizes = [1, 24], strides = [1, 1]} : vector<3x24xf32> to vector<1x24xf32>
    %258 = vector.extract_strided_slice %256 {offsets = [0, 0], sizes = [1, 24], strides = [1, 1]} : vector<3x24xf32> to vector<1x24xf32>
    %259 = arith.subf %257, %258 : vector<1x24xf32>
    %260 = vector.extract_strided_slice %254 {offsets = [1, 0], sizes = [1, 24], strides = [1, 1]} : vector<3x24xf32> to vector<1x24xf32>
    %261 = vector.extract_strided_slice %256 {offsets = [1, 0], sizes = [1, 24], strides = [1, 1]} : vector<3x24xf32> to vector<1x24xf32>
    %262 = arith.subf %260, %261 : vector<1x24xf32>
    %263 = vector.extract_strided_slice %254 {offsets = [2, 0], sizes = [1, 24], strides = [1, 1]} : vector<3x24xf32> to vector<1x24xf32>
    %264 = vector.extract_strided_slice %256 {offsets = [2, 0], sizes = [1, 24], strides = [1, 1]} : vector<3x24xf32> to vector<1x24xf32>
    %265 = arith.subf %263, %264 : vector<1x24xf32>
    %266 = arith.mulf %259, %259 : vector<1x24xf32>
    %267 = arith.mulf %262, %262 : vector<1x24xf32>
    %268 = arith.addf %266, %267 : vector<1x24xf32>
    %269 = arith.mulf %265, %265 : vector<1x24xf32>
    %270 = arith.addf %268, %269 : vector<1x24xf32>
    %271 = arith.addf %250, %252 : vector<32x24xf32>
    %c1_108 = arith.constant 1 : index
    %c0_109 = arith.constant 0 : index
    %c0_110 = arith.constant 0 : index
    %272 = vector.load %arg8[%c1_108, %c0_109, %c0_110] : memref<2x32x1xf32, #tpu.memory_space<vmem>>, vector<1x32x1xf32>
    %273 = vector.shape_cast %272 : vector<1x32x1xf32> to vector<32x1xf32>
    %274 = vector.broadcast %273 : vector<32x1xf32> to vector<32x24xf32>
    %275 = vector.broadcast %270 : vector<1x24xf32> to vector<32x24xf32>
    %276 = arith.mulf %274, %275 : vector<32x24xf32>
    %277 = arith.addf %271, %276 : vector<32x24xf32>
    %c1_111 = arith.constant 1 : index
    %c0_112 = arith.constant 0 : index
    %c0_113 = arith.constant 0 : index
    %278 = vector.load %arg9[%c1_111, %c0_112, %c0_113] : memref<2x32x1xf32, #tpu.memory_space<vmem>>, vector<1x32x1xf32>
    %279 = vector.shape_cast %278 : vector<1x32x1xf32> to vector<32x1xf32>
    %280 = vector.broadcast %279 : vector<32x1xf32> to vector<32x24xf32>
    %281 = arith.addf %277, %280 : vector<32x24xf32>
    %cst_114 = arith.constant 0.000000e+00 : f32
    %282 = vector.broadcast %cst_114 : f32 to vector<32x24xf32>
    %283 = arith.maximumf %281, %282 : vector<32x24xf32>
    %c1_115 = arith.constant 1 : index
    %c0_116 = arith.constant 0 : index
    %c0_117 = arith.constant 0 : index
    %284 = vector.load %arg10[%c1_115, %c0_116, %c0_117] : memref<2x32x32xbf16, #tpu.memory_space<vmem>>, vector<1x32x32xbf16>
    %285 = vector.shape_cast %284 : vector<1x32x32xbf16> to vector<32x32xbf16>
    %286 = arith.truncf %283 : vector<32x24xf32> to vector<32x24xbf16>
    %cst_118 = arith.constant dense<0.000000e+00> : vector<32x24xf32>
    %287 = tpu.matmul %285, %286, %cst_118 {dimension_numbers = #tpu.dot_dimension_numbers<[1], [0], [0], [1], [0, 0, 1, 1], [], []>} : vector<32x32xbf16>, vector<32x24xbf16>, vector<32x24xf32> -> vector<32x24xf32>
    %c1_119 = arith.constant 1 : index
    %c0_120 = arith.constant 0 : index
    %c0_121 = arith.constant 0 : index
    %288 = vector.load %arg11[%c1_119, %c0_120, %c0_121] : memref<2x32x1xf32, #tpu.memory_space<vmem>>, vector<1x32x1xf32>
    %289 = vector.shape_cast %288 : vector<1x32x1xf32> to vector<32x1xf32>
    %290 = vector.broadcast %289 : vector<32x1xf32> to vector<32x24xf32>
    %291 = arith.addf %287, %290 : vector<32x24xf32>
    %cst_122 = arith.constant 0.000000e+00 : f32
    %292 = vector.broadcast %cst_122 : f32 to vector<32x24xf32>
    %293 = arith.maximumf %291, %292 : vector<32x24xf32>
    %c1_123 = arith.constant 1 : index
    %c0_124 = arith.constant 0 : index
    %c0_125 = arith.constant 0 : index
    %294 = vector.load %arg12[%c1_123, %c0_124, %c0_125] : memref<2x32x32xbf16, #tpu.memory_space<vmem>>, vector<1x32x32xbf16>
    %295 = vector.shape_cast %294 : vector<1x32x32xbf16> to vector<32x32xbf16>
    %296 = arith.truncf %293 : vector<32x24xf32> to vector<32x24xbf16>
    %cst_126 = arith.constant dense<0.000000e+00> : vector<32x24xf32>
    %297 = tpu.matmul %295, %296, %cst_126 {dimension_numbers = #tpu.dot_dimension_numbers<[1], [0], [0], [1], [0, 0, 1, 1], [], []>} : vector<32x32xbf16>, vector<32x24xbf16>, vector<32x24xf32> -> vector<32x24xf32>
    %c1_127 = arith.constant 1 : index
    %c0_128 = arith.constant 0 : index
    %c0_129 = arith.constant 0 : index
    %298 = vector.load %arg13[%c1_127, %c0_128, %c0_129] : memref<2x32x1xf32, #tpu.memory_space<vmem>>, vector<1x32x1xf32>
    %299 = vector.shape_cast %298 : vector<1x32x1xf32> to vector<32x1xf32>
    %300 = vector.broadcast %299 : vector<32x1xf32> to vector<32x24xf32>
    %301 = arith.addf %297, %300 : vector<32x24xf32>
    %cst_130 = arith.constant 0.000000e+00 : f32
    %302 = vector.broadcast %cst_130 : f32 to vector<32x24xf32>
    %303 = arith.maximumf %301, %302 : vector<32x24xf32>
    %304 = arith.truncf %303 : vector<32x24xf32> to vector<32x24xbf16>
    %cst_131 = arith.constant dense<0.000000e+00> : vector<32x8xf32>
    %305 = tpu.matmul %304, %19, %cst_131 {dimension_numbers = #tpu.dot_dimension_numbers<[1], [0], [0], [1], [0, 0, 1, 1], [], []>} : vector<32x24xbf16>, vector<24x8xbf16>, vector<32x8xf32> -> vector<32x8xf32>
    %c1_132 = arith.constant 1 : index
    %c0_133 = arith.constant 0 : index
    %c0_134 = arith.constant 0 : index
    %306 = vector.load %arg20[%c1_132, %c0_133, %c0_134] : memref<2x32x32xbf16, #tpu.memory_space<vmem>>, vector<1x32x32xbf16>
    %307 = vector.shape_cast %306 : vector<1x32x32xbf16> to vector<32x32xbf16>
    %308 = arith.truncf %305 : vector<32x8xf32> to vector<32x8xbf16>
    %cst_135 = arith.constant dense<0.000000e+00> : vector<32x8xf32>
    %309 = tpu.matmul %307, %308, %cst_135 {dimension_numbers = #tpu.dot_dimension_numbers<[1], [0], [0], [1], [0, 0, 1, 1], [], []>} : vector<32x32xbf16>, vector<32x8xbf16>, vector<32x8xf32> -> vector<32x8xf32>
    %310 = arith.addf %248, %309 : vector<32x8xf32>
    %c1_136 = arith.constant 1 : index
    %c0_137 = arith.constant 0 : index
    %c0_138 = arith.constant 0 : index
    %311 = vector.load %arg21[%c1_136, %c0_137, %c0_138] : memref<2x32x1xf32, #tpu.memory_space<vmem>>, vector<1x32x1xf32>
    %312 = vector.shape_cast %311 : vector<1x32x1xf32> to vector<32x1xf32>
    %313 = vector.broadcast %312 : vector<32x1xf32> to vector<32x8xf32>
    %314 = arith.addf %310, %313 : vector<32x8xf32>
    %cst_139 = arith.constant 0.000000e+00 : f32
    %315 = vector.broadcast %cst_139 : f32 to vector<32x8xf32>
    %316 = arith.maximumf %314, %315 : vector<32x8xf32>
    %c1_140 = arith.constant 1 : index
    %c0_141 = arith.constant 0 : index
    %c0_142 = arith.constant 0 : index
    %317 = vector.load %arg22[%c1_140, %c0_141, %c0_142] : memref<2x32x32xbf16, #tpu.memory_space<vmem>>, vector<1x32x32xbf16>
    %318 = vector.shape_cast %317 : vector<1x32x32xbf16> to vector<32x32xbf16>
    %319 = arith.truncf %316 : vector<32x8xf32> to vector<32x8xbf16>
    %cst_143 = arith.constant dense<0.000000e+00> : vector<32x8xf32>
    %320 = tpu.matmul %318, %319, %cst_143 {dimension_numbers = #tpu.dot_dimension_numbers<[1], [0], [0], [1], [0, 0, 1, 1], [], []>} : vector<32x32xbf16>, vector<32x8xbf16>, vector<32x8xf32> -> vector<32x8xf32>
    %c1_144 = arith.constant 1 : index
    %c0_145 = arith.constant 0 : index
    %c0_146 = arith.constant 0 : index
    %321 = vector.load %arg23[%c1_144, %c0_145, %c0_146] : memref<2x32x1xf32, #tpu.memory_space<vmem>>, vector<1x32x1xf32>
    %322 = vector.shape_cast %321 : vector<1x32x1xf32> to vector<32x1xf32>
    %323 = vector.broadcast %322 : vector<32x1xf32> to vector<32x8xf32>
    %324 = arith.addf %320, %323 : vector<32x8xf32>
    %cst_147 = arith.constant 2.000000e+00 : f32
    %325 = vector.broadcast %cst_147 : f32 to vector<32x8xf32>
    %326 = arith.mulf %325, %241 : vector<32x8xf32>
    %327 = arith.addf %326, %324 : vector<32x8xf32>
    %cst_148 = arith.constant dense<0.000000e+00> : vector<8xf32>
    %328 = vector.multi_reduction <add>, %327, %cst_148 [0] : vector<32x8xf32> to vector<8xf32>
    %329 = vector.shape_cast %328 : vector<8xf32> to vector<1x8xf32>
    %cst_149 = arith.constant 3.200000e+01 : f32
    %330 = vector.broadcast %cst_149 : f32 to vector<1x8xf32>
    %331 = arith.divf %329, %330 : vector<1x8xf32>
    %332 = vector.broadcast %331 : vector<1x8xf32> to vector<32x8xf32>
    %333 = arith.subf %327, %332 : vector<32x8xf32>
    %334 = vector.broadcast %331 : vector<1x8xf32> to vector<32x8xf32>
    %335 = arith.subf %327, %334 : vector<32x8xf32>
    %336 = arith.mulf %333, %335 : vector<32x8xf32>
    %cst_150 = arith.constant dense<0.000000e+00> : vector<8xf32>
    %337 = vector.multi_reduction <add>, %336, %cst_150 [0] : vector<32x8xf32> to vector<8xf32>
    %338 = vector.shape_cast %337 : vector<8xf32> to vector<1x8xf32>
    %cst_151 = arith.constant 3.200000e+01 : f32
    %339 = vector.broadcast %cst_151 : f32 to vector<1x8xf32>
    %340 = arith.divf %338, %339 : vector<1x8xf32>
    %341 = vector.broadcast %331 : vector<1x8xf32> to vector<32x8xf32>
    %342 = arith.subf %327, %341 : vector<32x8xf32>
    %cst_152 = arith.constant 9.99999974E-6 : f32
    %343 = vector.broadcast %cst_152 : f32 to vector<1x8xf32>
    %344 = arith.addf %340, %343 : vector<1x8xf32>
    %345 = math.rsqrt %344 : vector<1x8xf32>
    %346 = vector.broadcast %345 : vector<1x8xf32> to vector<32x8xf32>
    %347 = arith.mulf %342, %346 : vector<32x8xf32>
    %c1_153 = arith.constant 1 : index
    %c0_154 = arith.constant 0 : index
    %c0_155 = arith.constant 0 : index
    %348 = vector.load %arg24[%c1_153, %c0_154, %c0_155] : memref<2x32x1xf32, #tpu.memory_space<vmem>>, vector<1x32x1xf32>
    %349 = vector.shape_cast %348 : vector<1x32x1xf32> to vector<32x1xf32>
    %350 = vector.broadcast %349 : vector<32x1xf32> to vector<32x8xf32>
    %351 = arith.mulf %347, %350 : vector<32x8xf32>
    %c1_156 = arith.constant 1 : index
    %c0_157 = arith.constant 0 : index
    %c0_158 = arith.constant 0 : index
    %352 = vector.load %arg25[%c1_156, %c0_157, %c0_158] : memref<2x32x1xf32, #tpu.memory_space<vmem>>, vector<1x32x1xf32>
    %353 = vector.shape_cast %352 : vector<1x32x1xf32> to vector<32x1xf32>
    %354 = vector.broadcast %353 : vector<32x1xf32> to vector<32x8xf32>
    %355 = arith.addf %351, %354 : vector<32x8xf32>
    %356 = arith.addf %241, %355 : vector<32x8xf32>
    %357 = arith.truncf %356 : vector<32x8xf32> to vector<32x8xbf16>
    %cst_159 = arith.constant dense<0.000000e+00> : vector<32x2xf32>
    %358 = tpu.matmul %357, %26, %cst_159 {dimension_numbers = #tpu.dot_dimension_numbers<[1], [0], [0], [1], [0, 0, 1, 1], [], []>} : vector<32x8xbf16>, vector<8x2xbf16>, vector<32x2xf32> -> vector<32x2xf32>
    %c0_160 = arith.constant 0 : index
    %c0_161 = arith.constant 0 : index
    %359 = vector.load %arg26[%c0_160, %c0_161] : memref<32x32xbf16, #tpu.memory_space<vmem>>, vector<32x32xbf16>
    %360 = arith.truncf %358 : vector<32x2xf32> to vector<32x2xbf16>
    %cst_162 = arith.constant dense<0.000000e+00> : vector<32x2xf32>
    %361 = tpu.matmul %359, %360, %cst_162 {dimension_numbers = #tpu.dot_dimension_numbers<[1], [0], [0], [1], [0, 0, 1, 1], [], []>} : vector<32x32xbf16>, vector<32x2xbf16>, vector<32x2xf32> -> vector<32x2xf32>
    %c0_163 = arith.constant 0 : index
    %c0_164 = arith.constant 0 : index
    %362 = vector.load %arg27[%c0_163, %c0_164] : memref<32x1xf32, #tpu.memory_space<vmem>>, vector<32x1xf32>
    %363 = vector.broadcast %362 : vector<32x1xf32> to vector<32x2xf32>
    %364 = arith.addf %361, %363 : vector<32x2xf32>
    %cst_165 = arith.constant 0.000000e+00 : f32
    %365 = vector.broadcast %cst_165 : f32 to vector<32x2xf32>
    %366 = arith.maximumf %364, %365 : vector<32x2xf32>
    %c0_166 = arith.constant 0 : index
    %c0_167 = arith.constant 0 : index
    %367 = vector.load %arg28[%c0_166, %c0_167] : memref<1x32xbf16, #tpu.memory_space<vmem>>, vector<1x32xbf16>
    %368 = arith.truncf %366 : vector<32x2xf32> to vector<32x2xbf16>
    %cst_168 = arith.constant dense<0.000000e+00> : vector<1x2xf32>
    %369 = tpu.matmul %367, %368, %cst_168 {dimension_numbers = #tpu.dot_dimension_numbers<[1], [0], [0], [1], [0, 0, 1, 1], [], []>} : vector<1x32xbf16>, vector<32x2xbf16>, vector<1x2xf32> -> vector<1x2xf32>
    %c0_169 = arith.constant 0 : index
    %c0_170 = arith.constant 0 : index
    %370 = vector.load %arg29[%c0_169, %c0_170] : memref<1x1xf32, #tpu.memory_space<vmem>>, vector<1x1xf32>
    %371 = vector.broadcast %370 : vector<1x1xf32> to vector<1x2xf32>
    %372 = arith.addf %369, %371 : vector<1x2xf32>
    %c0_171 = arith.constant 0 : index
    %c0_172 = arith.constant 0 : index
    %373 = vector.load %arg30[%c0_171, %c0_172] : memref<1x2xf32, #tpu.memory_space<vmem>>, vector<1x2xf32>
    tpu.vector_store %arg30[%c0_171, %c0_172], %372 {strides = array<i32>} : memref<1x2xf32, #tpu.memory_space<vmem>>, vector<1x2xf32>,
    return
  }
}

</mosaic_0001>

<bundles_post_ra>
// kernel: tpu_custom_call.1
= control target key start
LH: loop header
LB: loop body
LE: loop exit
PB: predicated region body
PF: predicated region fallthrough
CT: control target
= control target key end

     0   :  { %s3526_s6 = smov 1   ;;  %s3527_s10 = smov 2   ;;  %s4230_s0 = inlined_call_operand.smem [shape: u32[31], index: -1, kind: input, shape index: {}] }
   0x1   :  { %s3569_s5 = sld [smem:[%s4230_s0]]   ;;  %s3528_s14 = smov 3  }
   0x2   :  { %s3574_s9 = sld [smem:[%s4230_s0 + %s3526_s6]]   ;;  %s3529_s18 = smov 4  }
   0x3   :  { %s3579_s13 = sld [smem:[%s4230_s0 + %s3527_s10]]   ;;  %s3530_s22 = smov 5  }
   0x4   :  { %s3584_s17 = sld [smem:[%s4230_s0 + %s3528_s14]]   ;;  %s3531_s26 = smov 6  }
   0x5   :  { %s3589_s21 = sld [smem:[%s4230_s0 + %s3529_s18]]   ;;  %s3532_s30 = smov 7  }
   0x6   :  { %s3594_s25 = sld [smem:[%s4230_s0 + %s3530_s22]]   ;;  %s3533_s4 = smov 8  }
   0x7   :  { %s3599_s29 = sld [smem:[%s4230_s0 + %s3531_s26]]   ;;  %s3534_s10 = smov 9  }
   0x8   :  { %4237 = sst [smem:[#allocation6_spill]] %s3574_s9  ;;  %s3535_s15 = smov 10  }
   0x9   :  { %4238 = sst [smem:[#allocation7_spill]] %s3579_s13  ;;  %s3536_s20 = smov 11  }
   0xa   :  { %s3604_s3 = sld [smem:[%s4230_s0 + %s3532_s30]]   ;;  %s3537_s26 = smov 12  }
   0xb   :  { %s3609_s8 = sld [smem:[%s4230_s0 + %s3533_s4]]   ;;  %s3538_s1 = smov 13  }
   0xc   :  { %4239 = sst [smem:[#allocation8_spill]] %s3594_s25  ;;  %s3539_s7 = smov 14  }
   0xd   :  { %4240 = sst [smem:[#allocation9_spill]] %s3599_s29  ;;  %s3541_s22 = smov 16  }
   0xe   :  { %s3614_s14 = sld [smem:[%s4230_s0 + %s3534_s10]]   ;;  %s3542_s28 = smov 17  }
   0xf   :  { %s3619_s19 = sld [smem:[%s4230_s0 + %s3535_s15]]   ;;  %s3540_s15 = smov 15  }
  0x10   :  { %s3624_s24 = sld [smem:[%s4230_s0 + %s3536_s20]]   ;;  %s3555_s10 = smov 30  }
  0x11   :  { %s3629_s30 = sld [smem:[%s4230_s0 + %s3537_s26]]  }
  0x12   :  { %s3634_s6 = sld [smem:[%s4230_s0 + %s3538_s1]]  }
  0x13   :  { %s3639_s12 = sld [smem:[%s4230_s0 + %s3539_s7]]   ;;  %s3543_s7 = smov 18  }
  0x14   :  { %s3644_s20 = sld [smem:[%s4230_s0 + %s3540_s15]]   ;;  %s3544_s15 = smov 19  }
  0x15   :  { %4241 = sst [smem:[#allocation10_spill]] %s3619_s19 }
  0x16   :  { %s3649_s27 = sld [smem:[%s4230_s0 + %s3541_s22]]   ;;  %s3545_s22 = smov 20  }
  0x17   :  { %4242 = sst [smem:[#allocation11_spill]] %s3629_s30 }
  0x18   :  { %s3654_s4 = sld [smem:[%s4230_s0 + %s3542_s28]]   ;;  %s3546_s28 = smov 21  }
  0x19   :  { %4243 = sst [smem:[#allocation12_spill]] %s3639_s12 }
  0x1a   :  { %s3659_s29 = sld [smem:[%s4230_s0 + %s3543_s7]]   ;;  %s3547_s7 = smov 22  }
  0x1b   :  { %s3664_s12 = sld [smem:[%s4230_s0 + %s3544_s15]]   ;;  %s3548_s15 = smov 23  }
  0x1c   :  { %4244 = sst [smem:[#allocation13_spill]] %s3649_s27 }
  0x1d   :  { %s3669_s27 = sld [smem:[%s4230_s0 + %s3545_s22]]   ;;  %s3549_s22 = smov 24  }
  0x1e   :  { %s3674_s30 = sld [smem:[%s4230_s0 + %s3546_s28]]   ;;  %s3550_s28 = smov 25  }
  0x1f   :  { %s3684_s19 = sld [smem:[%s4230_s0 + %s3548_s15]]   ;;  %s3552_s15 = smov 27  }
  0x20   :  { %4245 = sst [smem:[#allocation14_spill]] %s3659_s29 }
  0x21   :  { %4246 = sst [smem:[#allocation15_spill]] %s3664_s12 }
  0x22   :  { %s3679_s29 = sld [smem:[%s4230_s0 + %s3547_s7]]   ;;  %s3551_s7 = smov 26  }
  0x23   :  { %4247 = sst [smem:[#allocation16_spill]] %s3669_s27 }
  0x24   :  { %s3689_s27 = sld [smem:[%s4230_s0 + %s3549_s22]]   ;;  %s3553_s22 = smov 28  }
  0x25   :  { %s3694_s9 = sld [smem:[%s4230_s0 + %s3550_s28]]   ;;  %s3554_s28 = smov 29  }
  0x26   :  { %s3704_s13 = sld [smem:[%s4230_s0 + %s3552_s15]]  }
  0x27   :  { %s3709_s25 = sld [smem:[%s4230_s0 + %s3553_s22]]  }
  0x28   :  { %4248 = sst [smem:[#allocation17_spill]] %s3679_s29 }
  0x29   :  { %s3699_s29 = sld [smem:[%s4230_s0 + %s3551_s7]]  }
  0x2a   :  { %s2895_s12 = sld [smem:[%s4230_s0 + %s3554_s28]]  }
  0x2f   :  { %4249 = sst [smem:[#allocation18_spill]] %s3699_s29 }
  0x30   :  { %s3717_s29 = sld [smem:[%s4230_s0 + %s3555_s10]]   ;;  %v66_v0 = vstv %s2895_s12 }
  0x31   :  { %67 = vst [vmem:[#allocation2] sm:$0x1] %v66_v0 }
  0x32   :  { %v184_v1 = vld [vmem:[%s3569_s5] sm:$0xff]  ;;  %v185_v2 = vld [vmem:[%s3569_s5 + $0x8] sm:$0xff]  ;;  %v186_v3 = vld [vmem:[%s3569_s5 + $0x10] sm:$0xff]  ;;  %vm247_vm0 = vcmask 261120   ;;  %v3556_v6 = vmov 0  }
  0x33   :  { %v205_v4 = vpack.c.bf16 %v185_v2, %v184_v1  ;;  %v187_v5 = vld [vmem:[%s3569_s5 + $0x18] sm:$0xff]  ;;  %3457 = vset.pattern.permute.xlu1 %v3556_v6  ;;  %3456 = vset.pattern.permute.xlu0 %v3556_v6  ;;  %v3458_v8 = vld [vmem:[%s3604_s3] sm:$0xff]   ;;  %v628_v9 = vld [vmem:[%s3609_s8 + $0x10] sm:$0xff] }
  0x34   :  { %v206_v7 = vpack.c.bf16 %v187_v5, %v186_v3  ;;  %3180 = vmatprep.mubr.msk.bf16.mxu0 %vm247_vm0, %v3458_v8  ;;  %v626_v10 = vld [vmem:[%s3609_s8] sm:$0xff]  ;;  %642 = vperm.xlu1 %3457, %v628_v9   ;;  %v3459_v11 = vld [vmem:[%s3604_s3 + $0x8] sm:$0xff]   ;;  %v629_v12 = vld [vmem:[%s3609_s8 + $0x18] sm:$0xff] }
  0x35   :  { %3176 = vmatprep.subr.bf16.mxu0 %v205_v4  ;;  %632 = vperm.xlu0 %3456, %v626_v10   ;;  %v627_v13 = vld [vmem:[%s3609_s8 + $0x8] sm:$0xff]  ;;  %v3460_v14 = vld [vmem:[%s3604_s3 + $0x10] sm:$0xff]   ;;  %v662_v16 = vld [vmem:[%s3614_s14] sm:$0xff] }
  0x36   :  { %3177 = vmatpush3.bf16.msra.mxu0 %v205_v4  ;;  %v663_v15 = vld [vmem:[%s3614_s14 + $0x8] sm:$0xff]  ;;  %v3461_v17 = vld [vmem:[%s3604_s3 + $0x18] sm:$0xff]   ;;  %v664_v19 = vld [vmem:[%s3614_s14 + $0x10] sm:$0xff] }
  0x37   :  { %3178 = vmatprep.subr.bf16.mxu0 %v206_v7  ;;  %v665_v18 = vld [vmem:[%s3614_s14 + $0x18] sm:$0xff]  ;;  %v701_v20 = vld [vmem:[%s3624_s24 + $0x8] sm:$0xff]  ;;  %v700_v21 = vld [vmem:[%s3624_s24] sm:$0xff] }
  0x38   :  { %647 = vperm.xlu1 %3457, %v629_v12   ;;  %v703_v22 = vld [vmem:[%s3624_s24 + $0x18] sm:$0xff]  ;;  %v702_v23 = vld [vmem:[%s3624_s24 + $0x10] sm:$0xff]  ;;  %v800_v24 = vld [vmem:[%s3634_s6 + $0x8] sm:$0xff] }
  0x39   :  { %637 = vperm.xlu0 %3456, %v627_v13   ;;  %v799_v25 = vld [vmem:[%s3634_s6] sm:$0xff]  ;;  %v802_v26 = vld [vmem:[%s3634_s6 + $0x18] sm:$0xff]  ;;  %v801_v27 = vld [vmem:[%s3634_s6 + $0x10] sm:$0xff] }
  0x3a   :  { %3179 = vmatpush3.bf16.msra.mxu0 %v206_v7 }
  0x3c   :  { %673 = vperm.xlu1 %3457, %v663_v15  }
  0x3d   :  { %3181 = vmatmul.mubr.msk.bf16.vlgmr.msra.gmra.mrb[0].mxu0 %vm247_vm0, %v3459_v11  ;;  %668 = vperm.xlu0 %3456, %v662_v16  }
  0x3e   :  { %3184 = vmatprep.mubr.msk.bf16.mxu0 %vm247_vm0, %v3460_v14 }
  0x40   :  { %683 = vperm.xlu1 %3457, %v665_v18  }
  0x41   :  { %678 = vperm.xlu0 %3456, %v664_v19  }
  0x44   :  { %711 = vperm.xlu1 %3457, %v701_v20  }
  0x45   :  { %3185 = vmatmul.mubr.msk.bf16.gmra.mrb[4].mxu0 %vm247_vm0, %v3461_v17  ;;  %706 = vperm.xlu0 %3456, %v700_v21  }
  0x48   :  { %721 = vperm.xlu1 %3457, %v703_v22  }
  0x49   :  { %716 = vperm.xlu0 %3456, %v702_v23  }
  0x4c   :  { %810 = vperm.xlu1 %3457, %v800_v24  }
  0x4d   :  { %805 = vperm.xlu0 %3456, %v799_v25  }
  0x4e   :  { %68 = vsyncpa [#allocation4], 0  ;;  %v899_v28 = vld [vmem:[%s3644_s20 + $0x8] sm:$0xff]  ;;  %v898_v29 = vld [vmem:[%s3644_s20] sm:$0xff]  ;;  %v130_v34 = vlaneseq  ;;  %v3557_v39 = vmov 0.0   ;;  %vm380_vm2 = vcmask 1043456  }
  0x4f   :  { %v901_v30 = vld [vmem:[%s3644_s20 + $0x18] sm:$0xff]  ;;  %v900_v31 = vld [vmem:[%s3644_s20 + $0x10] sm:$0xff]  ;;  %v153_v32 = vld [vmem:[%s3589_s21 + $0x8] sm:$0xff]  ;;  %s4250_s0 = sld [smem:[#allocation15_spill]]  ;;  %vm373_vm4 = vcmask 64512   ;;  %vm3558_vm5 = vmmov 0  }
  0x50   :  { %820 = vperm.xlu1 %3457, %v802_v26   ;;  %v152_v33 = vld [vmem:[%s3589_s21] sm:$0xff]  ;;  %v154_v36 = vld [vmem:[%s3589_s21 + $0x10] sm:$0xff]  ;;  %v3756_v37 = vshrl.u32 %v130_v34, 7  ;;  %v1146_v43 = vld [vmem:[%s3654_s4 + $0x8] sm:$0xff]  ;;  %s4252_s21 = sld [smem:[#allocation7_spill]]  ;;  %vm1085_vm10 = vcmask 1040384  }
  0x51   :  { %815 = vperm.xlu0 %3456, %v801_v27   ;;  %v1145_v35 = vld [vmem:[%s3654_s4] sm:$0xff]  ;;  %v1147_v42 = vld [vmem:[%s3654_s4 + $0x10] sm:$0xff]  ;;  %v1148_v46 = vld [vmem:[%s3654_s4 + $0x18] sm:$0xff]  ;;  %vm1087_vm11 = vcmask 1041408   ;;  %vm1090_vm12 = vcmask 195584   ;;  %s4263_s12 = sld [smem:[#allocation17_spill]] }
  0x52   :  { %v2899_v38 = vld [vmem:[%s3584_s17] ss:$0 sm:$0xff]  ;;  %v1370_v47 = vld [vmem:[%s3674_s30 + $0x10] sm:$0xff]  ;;  %v1369_v48 = vld [vmem:[%s3674_s30 + $0x8] sm:$0xff]  ;;  %s4251_s17 = sld [smem:[#allocation8_spill]]  ;;  %vm2851_vm14 = vcmask 8192  }
  0x53   :  { %vm146_vm1 = vcmp.eq.s32.totalorder %v3756_v37, %v2899_v38  ;;  %v1368_v45 = vld [vmem:[%s3674_s30] sm:$0xff]  ;;  %v1371_v50 = vld [vmem:[%s3674_s30 + $0x18] sm:$0xff]  ;;  %v1408_v51 = vld [vmem:[%s3684_s19 + $0x10] sm:$0xff] }
  0x54   :  { %909 = vperm.xlu1 %3457, %v899_v28   ;;  %v2900_v40 = vsel %vm146_vm1, 1.0, %v3557_v39  ;;  %v1406_v49 = vld [vmem:[%s3684_s19] sm:$0xff]  ;;  %v1407_v52 = vld [vmem:[%s3684_s19 + $0x8] sm:$0xff]  ;;  %v1409_v54 = vld [vmem:[%s3684_s19 + $0x18] sm:$0xff] }
  0x55   :  { %904 = vperm.xlu0 %3456, %v898_v29   ;;  %v3761_v41 = vpack.c.bf16 %v2900_v40, %v2900_v40  ;;  %v1546_v53 = vld [vmem:[%s3689_s27] sm:$0xff]  ;;  %v1547_v57 = vld [vmem:[%s3689_s27 + $0x8] sm:$0xff]  ;;  %v1548_v59 = vld [vmem:[%s3689_s27 + $0x10] sm:$0xff] }
  0x56   :  { %v3462_v55 = vld [vmem:[%s3604_s3 + $0x20] sm:$0xff]   ;;  %v3463_v58 = vld [vmem:[%s3604_s3 + $0x28] sm:$0xff]   ;;  %v1576_v61 = vld [vmem:[%s3694_s9 + $0x10] sm:$0xff] }
  0x57   :  { %v3767_v44 = vsel %vm380_vm2, %v3761_v41, 0  ;;  %3414 = vmatprep.subr.msk.bf16.mxu1 %vm380_vm2, %v3761_v41  ;;  %v1574_v56 = vld [vmem:[%s3694_s9] sm:$0xff]  ;;  %3188 = vmatprep.mubr.msk.bf16.mxu0 %vm247_vm0, %v3462_v55  ;;  %v1575_v60 = vld [vmem:[%s3694_s9 + $0x8] sm:$0xff]  ;;  %v1549_v62 = vld [vmem:[%s3689_s27 + $0x18] sm:$0xff] }
  0x58   :  { %919 = vperm.xlu1 %3457, %v901_v30   ;;  %3197 = vmatpush3.bf16.msra.mxu1 %v3767_v44  ;;  %v1179_v63 = vld [vmem:[%s4250_s0] sm:$0x1]  ;;  %v1577_v0 = vld [vmem:[%s3694_s9 + $0x18] sm:$0xff]  ;;  %v2999_v1 = vld [vmem:[%s3609_s8 + $0x28] sm:$0xff] }
  0x59   :  { %914 = vperm.xlu0 %3456, %v900_v31   ;;  %3202 = vmatprep.subr.bf16.mxu1 %v3557_v39  ;;  %v2998_v2 = vld [vmem:[%s3609_s8 + $0x20] sm:$0xff]  ;;  %v3001_v3 = vld [vmem:[%s3609_s8 + $0x38] sm:$0xff]  ;;  %v3000_v4 = vld [vmem:[%s3609_s8 + $0x30] sm:$0xff]  ;;  %s4255_s8 = sld [smem:[#allocation11_spill]] }
  0x5a   :  { %3189 = vmatmul.mubr.msk.bf16.gmra.mrb[8].mxu0 %vm247_vm0, %v3463_v58  ;;  %v3003_v5 = vld [vmem:[%s3614_s14 + $0x28] sm:$0xff]  ;;  %v3002_v6 = vld [vmem:[%s3614_s14 + $0x20] sm:$0xff]  ;;  %v3005_v7 = vld [vmem:[%s3614_s14 + $0x38] sm:$0xff] }
  0x5b   :  { %v3004_v8 = vld [vmem:[%s3614_s14 + $0x30] sm:$0xff]  ;;  %v3011_v9 = vld [vmem:[%s3624_s24 + $0x28] sm:$0xff]  ;;  %v3010_v10 = vld [vmem:[%s3624_s24 + $0x20] sm:$0xff]  ;;  %s4256_s14 = sld [smem:[#allocation12_spill]] }
  0x5c   :  { %159 = vperm.xlu1 %3457, %v153_v32   ;;  %v3013_v11 = vld [vmem:[%s3624_s24 + $0x38] sm:$0xff]  ;;  %v3012_v12 = vld [vmem:[%s3624_s24 + $0x30] sm:$0xff]  ;;  %v3023_v13 = vld [vmem:[%s3634_s6 + $0x28] sm:$0xff]  ;;  %s4260_s24 = sld [smem:[#allocation14_spill]] }
  0x5d   :  { %156 = vperm.xlu0 %3456, %v152_v33   ;;  %v3022_v14 = vld [vmem:[%s3634_s6 + $0x20] sm:$0xff]  ;;  %v3025_v15 = vld [vmem:[%s3634_s6 + $0x38] sm:$0xff]  ;;  %v3024_v16 = vld [vmem:[%s3634_s6 + $0x30] sm:$0xff]  ;;  %s4262_s6 = sld [smem:[#allocation9_spill]] }
  0x5e   :  { %v3043_v17 = vld [vmem:[%s3674_s30 + $0x28] sm:$0xff]  ;;  %v3042_v18 = vld [vmem:[%s3674_s30 + $0x20] sm:$0xff]  ;;  %v3045_v19 = vld [vmem:[%s3674_s30 + $0x38] sm:$0xff] }
  0x5f   :  { %v3044_v20 = vld [vmem:[%s3674_s30 + $0x30] sm:$0xff]  ;;  %v3051_v21 = vld [vmem:[%s3684_s19 + $0x28] sm:$0xff]  ;;  %v3050_v22 = vld [vmem:[%s3684_s19 + $0x20] sm:$0xff]  ;;  %s4261_s30 = sld [smem:[#allocation16_spill]] }
  0x60   :  { %1151 = vperm.xlu1 %3457, %v1145_v35   ;;  %v3053_v23 = vld [vmem:[%s3684_s19 + $0x38] sm:$0xff]  ;;  %v3052_v24 = vld [vmem:[%s3684_s19 + $0x30] sm:$0xff]  ;;  %v3059_v25 = vld [vmem:[%s3689_s27 + $0x28] sm:$0xff]  ;;  %s4259_s19 = sld [smem:[#allocation13_spill]] }
  0x61   :  { %162 = vperm.xlu0 %3456, %v154_v36   ;;  %v3058_v26 = vld [vmem:[%s3689_s27 + $0x20] sm:$0xff]  ;;  %v3060_v27 = vld [vmem:[%s3689_s27 + $0x30] sm:$0xff]  ;;  %v3061_v30 = vld [vmem:[%s3689_s27 + $0x38] sm:$0xff] }
  0x62   :  { %v175_v28 = vld [vmem:[%s4251_s17] sm:$0xff]  ;;  %v3064_v31 = vld [vmem:[%s3694_s9 + $0x30] sm:$0xff]  ;;  %v3063_v32 = vld [vmem:[%s3694_s9 + $0x28] sm:$0xff] }
  0x63   :  { %v3062_v29 = vld [vmem:[%s3694_s9 + $0x20] sm:$0xff]  ;;  %v3065_v35 = vld [vmem:[%s3694_s9 + $0x38] sm:$0xff]  ;;  %v2704_v36 = vld [vmem:[%s3704_s13 + $0x10] sm:$0xff]  ;;  %s4253_s9 = sld [smem:[#allocation6_spill]] }
  0x64   :  { %1161 = vperm.xlu1 %3457, %v1147_v42   ;;  %v2702_v33 = vld [vmem:[%s3704_s13] sm:$0xff]  ;;  %v2703_v38 = vld [vmem:[%s3704_s13 + $0x8] sm:$0xff]  ;;  %v2705_v42 = vld [vmem:[%s3704_s13 + $0x18] sm:$0xff]  ;;  %s4254_s13 = sld [smem:[#allocation10_spill]] }
  0x65   :  { %1156 = vperm.xlu0 %3456, %v1146_v43   ;;  %v2798_v40 = vld [vmem:[#allocation2] sm:$0x1] }
  0x68   :  { %1374 = vperm.xlu1 %3457, %v1368_v45   ;;  %v2897_v45 = vld [vmem:[%s4252_s21] ss:$0 sm:$0xff] }
  0x69   :  { %1166 = vperm.xlu0 %3456, %v1148_v46   ;;  %vm137_vm3 = vcmp.eq.s32.totalorder %v3756_v37, %v2897_v45 }
  0x6c   :  { %1384 = vperm.xlu1 %3457, %v1370_v47  }
  0x6d   :  { %1379 = vperm.xlu0 %3456, %v1369_v48  }
  0x70   :  { %1412 = vperm.xlu1 %3457, %v1406_v49  }
  0x71   :  { %1389 = vperm.xlu0 %3456, %v1371_v50  }
  0x74   :  { %1422 = vperm.xlu1 %3457, %v1408_v51   ;;  %v2898_v51 = vsel %vm137_vm3, 1.0, %v3557_v39 }
  0x75   :  { %1417 = vperm.xlu0 %3456, %v1407_v52  }
  0x78   :  { %1552 = vperm.xlu1 %3457, %v1546_v53  }
  0x79   :  { %1427 = vperm.xlu0 %3456, %v1409_v54   ;;  %v3835_v54 = vpack.c.bf16 %v2898_v51, %v2898_v51 }
  0x7c   :  { %1580 = vperm.xlu1 %3457, %v1574_v56  }
  0x7d   :  { %1557 = vperm.xlu0 %3456, %v1547_v57  }
  0x80   :  { %1562 = vperm.xlu1 %3457, %v1548_v59   ;;  %v3839_v59 = vsel %vm380_vm2, %v3835_v54, 0 }
  0x81   :  { %1585 = vperm.xlu0 %3456, %v1575_v60   ;;  %v3847_v60 = vld [vmem:[%s4253_s9] sm:$0x7] }
  0x84   :  { %1590 = vperm.xlu1 %3457, %v1576_v61   ;;  %v433_v61 = vpack.c.bf16 %v3847_v60, %v3847_v60 }
  0x85   :  { %1567 = vperm.xlu0 %3456, %v1549_v62  }
  0x88   :  { %1182 = vperm.xlu1 %3457, %v1179_v63  }
  0x89   :  { %1595 = vperm.xlu0 %3456, %v1577_v0  }
  0x8c   :  { %2001 = vperm.xlu1 %3457, %v2999_v1  }
  0x8d   :  { %1996 = vperm.xlu0 %3456, %v2998_v2  }
  0x90   :  { %2011 = vperm.xlu1 %3457, %v3001_v3  }
  0x91   :  { %2006 = vperm.xlu0 %3456, %v3000_v4  }
  0x94   :  { %2038 = vperm.xlu1 %3457, %v3003_v5  }
  0x95   :  { %2033 = vperm.xlu0 %3456, %v3002_v6  }
  0x98   :  { %2048 = vperm.xlu1 %3457, %v3005_v7  }
  0x99   :  { %2043 = vperm.xlu0 %3456, %v3004_v8  }
  0x9c   :  { %2078 = vperm.xlu1 %3457, %v3011_v9  }
  0x9d   :  { %2073 = vperm.xlu0 %3456, %v3010_v10  }
  0xa0   :  { %2088 = vperm.xlu1 %3457, %v3013_v11  }
  0xa1   :  { %2083 = vperm.xlu0 %3456, %v3012_v12  }
  0xa4   :  { %2179 = vperm.xlu1 %3457, %v3023_v13  }
  0xa5   :  { %2174 = vperm.xlu0 %3456, %v3022_v14  }
  0xa8   :  { %2189 = vperm.xlu1 %3457, %v3025_v15  }
  0xa9   :  { %2184 = vperm.xlu0 %3456, %v3024_v16  }
  0xac   :  { %2406 = vperm.xlu1 %3457, %v3043_v17  }
  0xad   :  { %2401 = vperm.xlu0 %3456, %v3042_v18  }
  0xb0   :  { %2416 = vperm.xlu1 %3457, %v3045_v19  }
  0xb1   :  { %2411 = vperm.xlu0 %3456, %v3044_v20  }
  0xb3   :  { %v3864_v63 = vpop.permute.xlu1 %642 }
  0xb4   :  { %2446 = vperm.xlu1 %3457, %v3051_v21   ;;  %v3862_v62 = vpop.permute.xlu0 %632 }
  0xb5   :  { %2441 = vperm.xlu0 %3456, %v3050_v22  }
  0xb7   :  { %v3868_v1 = vpop.permute.xlu1 %647 }
  0xb8   :  { %2456 = vperm.xlu1 %3457, %v3053_v23   ;;  %v3866_v0 = vpop.permute.xlu0 %637 }
  0xb9   :  { %2451 = vperm.xlu0 %3456, %v3052_v24  }
  0xbb   :  { %v3872_v3 = vpop.permute.xlu1 %673 }
  0xbc   :  { %2586 = vperm.xlu1 %3457, %v3059_v25   ;;  %v3870_v2 = vpop.permute.xlu0 %668 }
  0xbd   :  { %2581 = vperm.xlu0 %3456, %v3058_v26  }
  0xbf   :  { %v3876_v5 = vpop.permute.xlu1 %683 }
  0xc0   :  { %2591 = vperm.xlu1 %3457, %v3060_v27   ;;  %v3874_v4 = vpop.permute.xlu0 %678 }
  0xc1   :  { %177 = vperm.xlu0 %3456, %v175_v28  }
  0xc3   :  { %v3880_v7 = vpop.permute.xlu1 %711 }
  0xc4   :  { %2610 = vperm.xlu1 %3457, %v3062_v29   ;;  %v3878_v6 = vpop.permute.xlu0 %706 }
  0xc5   :  { %2596 = vperm.xlu0 %3456, %v3061_v30  }
  0xc7   :  { %v3884_v9 = vpop.permute.xlu1 %721 }
  0xc8   :  { %2620 = vperm.xlu1 %3457, %v3064_v31   ;;  %v3882_v8 = vpop.permute.xlu0 %716 }
  0xc9   :  { %2615 = vperm.xlu0 %3456, %v3063_v32  }
  0xcb   :  { %v3888_v11 = vpop.permute.xlu1 %810 }
  0xcc   :  { %2708 = vperm.xlu1 %3457, %v2702_v33   ;;  %v3886_v10 = vpop.permute.xlu0 %805 }
  0xcd   :  { %2625 = vperm.xlu0 %3456, %v3065_v35  }
  0xcf   :  { %v3892_v13 = vpop.permute.xlu1 %820 }
  0xd0   :  { %2718 = vperm.xlu1 %3457, %v2704_v36   ;;  %v3890_v12 = vpop.permute.xlu0 %815 }
  0xd1   :  { %2713 = vperm.xlu0 %3456, %v2703_v38  }
  0xd3   :  { %v3896_v15 = vpop.permute.xlu1 %909 }
  0xd4   :  { %2801 = vperm.xlu1 %3457, %v2798_v40   ;;  %v3894_v14 = vpop.permute.xlu0 %904 }
  0xd5   :  { %2723 = vperm.xlu0 %3456, %v2705_v42  }
  0xd7   :  { %v3900_v17 = vpop.permute.xlu1 %919 }
  0xd8   :  { %v3898_v16 = vpop.permute.xlu0 %914 }
  0xdb   :  { %v3904_v19 = vpop.permute.xlu1 %159 }
  0xdc   :  { %v3902_v18 = vpop.permute.xlu0 %156 }
  0xdf   :  { %v1152_v21 = vpop.permute.xlu1 %1151 }
  0xe0   :  { %v3906_v20 = vpop.permute.xlu0 %162 }
  0xe3   :  { %v1162_v25 = vpop.permute.xlu1 %1161 }
  0xe4   :  { %v1157_v22 = vpop.permute.xlu0 %1156 }
  0xe8   :  { %v1167_v27 = vpop.permute.xlu0 %1166 }
 0x110   :  { %v3182_v43 = vpop.f32.mrb[0].mxu0 }
 0x111   :  { %v306_v46 = vpop.f32.mrb[1].mxu0 }
 0x112   :  { %v3183_v47 = vpop.f32.mrb[2].mxu0 }
 0x113   :  { %v370_v48 = vpack.c.bf16 %v3183_v47, %v3182_v43  ;;  %v309_v49 = vpop.f32.mrb[3].mxu0  ;;  %v3464_v43 = vld [vmem:[%s4254_s13] sm:$0xff]  }
 0x114   :  { %v369_v50 = vpack.c.bf16 %v309_v49, %v306_v46 }
 0x118   :  { %v3186_v52 = vpop.f32.mrb[4].mxu0 }
 0x119   :  { %v322_v53 = vpop.f32.mrb[5].mxu0 }
 0x11a   :  { %v3187_v55 = vpop.f32.mrb[6].mxu0 }
 0x11b   :  { %v372_v56 = vpack.c.bf16 %v3187_v55, %v3186_v52  ;;  %v325_v57 = vpop.f32.mrb[7].mxu0 }
 0x11c   :  { %v371_v58 = vpack.c.bf16 %v325_v57, %v322_v53 }
 0x11e   :  { %3198 = vmatprep.mubr.msk.bf16.mxu1 %vm373_vm4, %v371_v58 }
 0x11f   :  { %3199 = vmatmul.mubr.msk.bf16.vlgmr.msra.gmra.mrb[0].mxu1 %vm373_vm4, %v372_v56 }
 0x120   :  { %3203 = vmatpush3.bf16.msra.mxu1 %v3839_v59  ;;  %3204 = vmatprep.mubr.msk.bf16.mxu1 %vm3558_vm5, %v3557_v39 }
 0x121   :  { %3208 = vmatprep.subr.bf16.mxu1 %v3557_v39 }
 0x127   :  { %3205 = vmatmul.mubr.msk.bf16.vlgmr.msra.gmra.mrb[4].mxu1 %vm373_vm4, %v433_v61 }
 0x128   :  { %3209 = vmatpush3.bf16.msra.mxu1 %v3767_v44  ;;  %3210 = vmatprep.mubr.msk.bf16.mxu1 %vm3558_vm5, %v3557_v39 }
 0x129   :  { %3415 = vmatprep.subr.msk.bf16.mxu1 %vm380_vm2, %v3835_v54 }
 0x12d   :  { %v3190_v23 = vpop.f32.mrb[8].mxu0 }
 0x12e   :  { %v338_v24 = vpop.f32.mrb[9].mxu0  ;;  %v1171_v29 = vadd.f32 %v3190_v23, %v1162_v25 }
 0x12f   :  { %3211 = vmatmul.mubr.msk.bf16.vlgmr.msra.gmra.mrb[8].mxu1 %vm373_vm4, %v433_v61  ;;  %v3191_v26 = vpop.f32.mrb[10].mxu0  ;;  %v1169_v30 = vadd.f32 %v1152_v21, %v338_v24 }
 0x130   :  { %3216 = vmatprep.mubr.msk.bf16.mxu1 %vm373_vm4, %v369_v50  ;;  %3215 = vmatpush3.bf16.msra.mxu1 %v3839_v59  ;;  %v341_v28 = vpop.f32.mrb[11].mxu0  ;;  %v1172_v31 = vadd.f32 %v3191_v26, %v1167_v27  ;;  %v1175_v33 = vmax.f32 %v1171_v29, 0.0 }
 0x131   :  { %v1170_v32 = vadd.f32 %v1157_v22, %v341_v28  ;;  %v1173_v35 = vmax.f32 %v1169_v30, 0.0 }
 0x132   :  { %v1176_v36 = vmax.f32 %v1172_v31, 0.0 }
 0x133   :  { %v1174_v38 = vmax.f32 %v1170_v32, 0.0 }
 0x134   :  { %v3908_v40 = vpack.c.bf16 %v1176_v36, %v1175_v33  ;;  %v3923_v33 = vsub.s32 0, %v3756_v37 }
 0x135   :  { %v3910_v42 = vpack.c.bf16 %v1174_v38, %v1173_v35 }
 0x137   :  { %3217 = vmatmul.mubr.msk.bf16.vlgmr.msra.gmra.mrb[0].mxu1 %vm373_vm4, %v370_v48 }
 0x138   :  { %3224 = vmatprep.mubr.msk.bf16.mxu1 %vm247_vm0, %v3464_v43 }
 0x1fa   :  { %v474_v45 = vpop.f32.mrb[4].mxu1 }
 0x1fb   :  { %v3206_v46 = vpop.f32.mrb[5].mxu1 }
 0x1fc   :  { %v477_v47 = vpop.f32.mrb[6].mxu1 }
 0x1fd   :  { %v3207_v48 = vpop.f32.mrb[7].mxu1 }
 0x202   :  { %v514_v49 = vpop.f32.mrb[8].mxu1 }
 0x203   :  { %v3914_v50 = vsub.f32 %v474_v45, %v514_v49  ;;  %v530_v51 = vrot.slane %v514_v49, 1  ;;  %v533_v52 = vrot.slane %v514_v49, 7  ;;  %v540_v53 = vrot.slane %v514_v49, 6  ;;  %v3212_v55 = vpop.f32.mrb[9].mxu1 }
 0x204   :  { %v543_v56 = vrot.slane %v514_v49, 2  ;;  %v517_v57 = vpop.f32.mrb[10].mxu1 }
 0x205   :  { %v532_v58 = vmul.f32 %v530_v51, %v474_v45  ;;  %v535_v61 = vmul.f32 %v533_v52, %v474_v45  ;;  %v542_v21 = vmul.f32 %v540_v53, %v474_v45  ;;  %v3213_v22 = vpop.f32.mrb[11].mxu1  ;;  %v521_v23 = vmul.f32 %v3914_v50, %v3914_v50 }
 0x206   :  { %v545_v24 = vmul.f32 %v543_v56, %v474_v45 }
 0x207   :  { %v537_v25 = vrot.slane %v535_v61, 1  ;;  %v523_v26 = vrot.slane %v521_v23, 1  ;;  %v526_v30 = vrot.slane %v521_v23, 2 }
 0x208   :  { %v547_v27 = vrot.slane %v545_v24, 6 }
 0x209   :  { %v3918_v28 = vsub.f32 %v532_v58, %v537_v25  ;;  %v525_v29 = vadd.f32 %v523_v26, %v521_v23 }
 0x20a   :  { %v3920_v31 = vsub.f32 %v542_v21, %v547_v27  ;;  %v3218_v32 = vpop.f32.mrb[0].mxu1 }
 0x20b   :  { %v551_v35 = vrot.slane %v3918_v28, 7  ;;  %v3928_v36 = vmul.f32 %v3918_v28, %v3914_v50  ;;  %v528_v38 = vadd.f32 %v526_v30, %v525_v29  ;;  %v611_v43 = vpop.f32.mrb[1].mxu1 }
 0x20c   :  { %v554_v45 = vmul.f32 %v3920_v31, %v3914_v50  ;;  %v565_v46 = vrot.slane %v3920_v31, 2  ;;  %v3219_v47 = vpop.f32.mrb[2].mxu1 }
 0x20d   :  { %v653_v48 = vrot.slane %v528_v38, %v3923_v33  ;;  %v614_v49 = vpop.f32.mrb[3].mxu1  ;;  %v3935_v37 = vmul.f32 %v551_v35, %v3914_v50  ;;  %v568_v51 = vrot.slane %v3928_v36, 1  ;;  %v3465_v38 = vld [vmem:[%s4254_s13 + $0x8] sm:$0xff]  }
 0x20e   :  { %v556_v52 = vrot.slane %v554_v45, 1  ;;  %v567_v53 = vmul.f32 %v565_v46, %v3914_v50 }
 0x20f   :  { %v656_v55 = vmul.f32 %v653_v48, %v3864_v63  ;;  %v654_v56 = vmul.f32 %v653_v48, %v3862_v62  ;;  %v657_v57 = vmul.f32 %v653_v48, %v3868_v1  ;;  %v655_v58 = vmul.f32 %v653_v48, %v3866_v0 }
 0x210   :  { %v3944_v61 = vsub.f32 %v3935_v37, %v556_v52  ;;  %v3946_v21 = vsub.f32 %v567_v53, %v568_v51 }
 0x211   :  { %v660_v22 = vadd.f32 %v3218_v32, %v656_v55  ;;  %v658_v23 = vadd.f32 %v654_v56, %v611_v43  ;;  %v661_v24 = vadd.f32 %v3219_v47, %v657_v57  ;;  %v659_v25 = vadd.f32 %v655_v58, %v614_v49 }
 0x213   :  { %v688_v26 = vadd.f32 %v3874_v4, %v660_v22  ;;  %v686_v63 = vadd.f32 %v3870_v2, %v658_v23  ;;  %v689_v62 = vadd.f32 %v3876_v5, %v661_v24  ;;  %v687_v0 = vadd.f32 %v3872_v3, %v659_v25  ;;  %v3466_v2 = vld [vmem:[%s3604_s3 + $0x30] sm:$0xff]   ;;  %v3467_v4 = vld [vmem:[%s3604_s3 + $0x38] sm:$0xff]   ;;  %v3468_v3 = vld [vmem:[%s4255_s8] sm:$0xff]  }
 0x214   :  { %3192 = vmatprep.mubr.msk.bf16.mxu0 %vm247_vm0, %v3466_v2 }
 0x215   :  { %v692_v1 = vmax.f32 %v688_v26, 0.0  ;;  %v690_v27 = vmax.f32 %v686_v63, 0.0  ;;  %v693_v29 = vmax.f32 %v689_v62, 0.0  ;;  %v691_v30 = vmax.f32 %v687_v0, 0.0  ;;  %3193 = vmatmul.mubr.msk.bf16.gmra.mrb[12].mxu0 %vm247_vm0, %v3467_v4 }
 0x216   :  { %3232 = vmatprep.mubr.msk.bf16.mxu0 %vm247_vm0, %v3468_v3 }
 0x217   :  { %v698_v32 = vpack.c.bf16 %v691_v30, %v690_v27  ;;  %v699_v35 = vpack.c.bf16 %v693_v29, %v692_v1  ;;  %v3978_v30 = vand.u32 127, %v130_v34 }
 0x219   :  { %3220 = vmatprep.subr.bf16.mxu1 %v698_v32  ;;  %vm166_vm6 = vcmp.eq.s32.totalorder %v3978_v30, %v3906_v20  ;;  %vm165_vm7 = vcmp.eq.s32.totalorder %v3978_v30, %v3904_v19  ;;  %vm164_vm8 = vcmp.eq.s32.totalorder %v3978_v30, %v3902_v18  ;;  %v3559_v20 = vmov 1.0|1.0  }
 0x21a   :  { %3221 = vmatpush3.bf16.msra.mxu1 %v698_v32  ;;  %v2903_v34 = vsel %vm166_vm6, 1.0, %v3557_v39  ;;  %vm3995_vm9 = vmpackc.low %vm165_vm7, %vm164_vm8 }
 0x21b   :  { %3222 = vmatprep.subr.bf16.mxu1 %v699_v35 }
 0x21e   :  { %3223 = vmatpush3.bf16.msra.mxu1 %v699_v35 }
 0x221   :  { %3225 = vmatmul.mubr.msk.bf16.vlgmr.msra.gmra.mrb[12].mxu1 %vm247_vm0, %v3465_v38 }
 0x2f4   :  { %v3226_v5 = vpop.f32.mrb[12].mxu1 }
 0x2f5   :  { %v783_v43 = vadd.f32 %v3226_v5, %v3882_v8  ;;  %v774_v45 = vpop.f32.mrb[13].mxu1  ;;  %v3469_v8 = vld [vmem:[%s4255_s8 + $0x8] sm:$0xff]  }
 0x2f6   :  { %v775_v46 = vadd.f32 %v774_v45, %v3878_v6  ;;  %v3227_v47 = vpop.f32.mrb[14].mxu1  ;;  %v3470_v6 = vld [vmem:[%s4256_s14] sm:$0xff]  }
 0x2f7   :  { %v786_v48 = vadd.f32 %v3227_v47, %v3884_v9  ;;  %v777_v49 = vpop.f32.mrb[15].mxu1  ;;  %v791_v52 = vmax.f32 %v783_v43, 0.0  ;;  %3240 = vmatprep.mubr.msk.bf16.mxu1 %vm247_vm0, %v3470_v6 }
 0x2f8   :  { %v778_v51 = vadd.f32 %v777_v49, %v3880_v7  ;;  %v789_v55 = vmax.f32 %v775_v46, 0.0 }
 0x2f9   :  { %v792_v53 = vmax.f32 %v786_v48, 0.0 }
 0x2fa   :  { %v790_v56 = vmax.f32 %v778_v51, 0.0 }
 0x2fb   :  { %v798_v57 = vpack.c.bf16 %v792_v53, %v791_v52 }
 0x2fc   :  { %v797_v58 = vpack.c.bf16 %v790_v56, %v789_v55 }
 0x2fe   :  { %3228 = vmatprep.subr.bf16.mxu0 %v797_v58 }
 0x2ff   :  { %3229 = vmatpush3.bf16.msra.mxu0 %v797_v58 }
 0x300   :  { %3230 = vmatprep.subr.bf16.mxu0 %v798_v57 }
 0x303   :  { %3231 = vmatpush3.bf16.msra.mxu0 %v798_v57 }
 0x304   :  { %3244 = vmatprep.subr.bf16.mxu0 %v3557_v39 }
 0x306   :  { %3233 = vmatmul.mubr.msk.bf16.vlgmr.msra.gmra.mrb[16].mxu0 %vm247_vm0, %v3469_v8 }
 0x307   :  { %3248 = vmatprep.mubr.msk.bf16.mxu0 %vm3558_vm5, %v3557_v39 }
 0x3d9   :  { %v3234_v7 = vpop.f32.mrb[16].mxu0 }
 0x3da   :  { %v882_v9 = vadd.f32 %v3234_v7, %v3890_v12  ;;  %v873_v22 = vpop.f32.mrb[17].mxu0 }
 0x3db   :  { %v874_v23 = vadd.f32 %v873_v22, %v3886_v10  ;;  %v3235_v24 = vpop.f32.mrb[18].mxu0  ;;  %v3471_v10 = vld [vmem:[%s4256_s14 + $0x8] sm:$0xff]  }
 0x3dc   :  { %v885_v25 = vadd.f32 %v3235_v24, %v3892_v13  ;;  %v876_v26 = vpop.f32.mrb[19].mxu0  ;;  %v890_v62 = vmax.f32 %v882_v9, 0.0  ;;  %v3999_v13 = vpack.c.bf16 %v2903_v34, %v2903_v34 }
 0x3dd   :  { %v877_v63 = vadd.f32 %v876_v26, %v3888_v11  ;;  %v888_v1 = vmax.f32 %v874_v23, 0.0 }
 0x3de   :  { %v891_v0 = vmax.f32 %v885_v25, 0.0  ;;  %v4010_v18 = vsel %vm380_vm2, %v3999_v13, 0 }
 0x3df   :  { %v889_v27 = vmax.f32 %v877_v63, 0.0 }
 0x3e0   :  { %v3975_v29 = vpack.c.bf16 %v891_v0, %v890_v62 }
 0x3e1   :  { %v3980_v12 = vpack.c.bf16 %v889_v27, %v888_v1 }
 0x3e3   :  { %3236 = vmatprep.subr.bf16.mxu1 %v3980_v12 }
 0x3e4   :  { %3237 = vmatpush3.bf16.msra.mxu1 %v3980_v12 }
 0x3e5   :  { %3238 = vmatprep.subr.bf16.mxu1 %v3975_v29 }
 0x3e8   :  { %3239 = vmatpush3.bf16.msra.mxu1 %v3975_v29 }
 0x3e9   :  { %3252 = vmatprep.subr.bf16.mxu1 %v3557_v39 }
 0x3eb   :  { %3241 = vmatmul.mubr.msk.bf16.vlgmr.msra.gmra.mrb[16].mxu1 %vm247_vm0, %v3471_v10 }
 0x3ec   :  { %3253 = vmatpush3.bf16.msk.msra.mxu1 %vm3995_vm9, %v3559_v20  ;;  %3256 = vmatprep.mubr.msk.bf16.mxu1 %vm3558_vm5, %v3557_v39 }
 0x3ed   :  { %3254 = vmatprep.subr.bf16.mxu1 %v3557_v39 }
 0x3f0   :  { %3255 = vmatpush3.bf16.msra.mxu1 %v4010_v18 }
 0x3f1   :  { %3268 = vmatprep.subr.msk.bf16.mxu1 %vm3995_vm9, %v3559_v20 }
 0x4be   :  { %v3242_v19 = vpop.f32.mrb[16].mxu1 }
 0x4bf   :  { %v981_v32 = vadd.f32 %v3242_v19, %v3898_v16  ;;  %v972_v35 = vpop.f32.mrb[17].mxu1  ;;  %v991_v16 = vld [vmem:[%s4259_s19] sm:$0x3] }
 0x4c0   :  { %v973_v38 = vadd.f32 %v972_v35, %v3894_v14  ;;  %v3243_v2 = vpop.f32.mrb[18].mxu1  ;;  %v1144_v14 = vld [vmem:[%s4260_s24] sm:$0x1] }
 0x4c1   :  { %v984_v4 = vadd.f32 %v3243_v2, %v3900_v17  ;;  %v975_v3 = vpop.f32.mrb[19].mxu1  ;;  %v989_v43 = vmax.f32 %v981_v32, 0.0 }
 0x4c2   :  { %v976_v5 = vadd.f32 %v975_v3, %v3896_v15  ;;  %v987_v46 = vmax.f32 %v973_v38, 0.0  ;;  %v561_v15 = vrot.slane %v3928_v36, 6 }
 0x4c3   :  { %v990_v45 = vmax.f32 %v984_v4, 0.0 }
 0x4c4   :  { %v988_v47 = vmax.f32 %v976_v5, 0.0  ;;  %v563_v17 = vsub.f32 %v3935_v37, %v561_v15  ;;  %v3472_v5 = vld [vmem:[%s4261_s30] sm:$0xff]  }
 0x4c5   :  { %v993_v48 = vpack.c.bf16 %v990_v45, %v989_v43  ;;  %v1375_v43 = vpop.permute.xlu1 %1374  ;;  %v2946_v15 = vld [vmem:[%s4262_s6] ss:$0 sm:$0xff] }
 0x4c6   :  { %v992_v49 = vpack.c.bf16 %v988_v47, %v987_v46 }
 0x4c8   :  { %3245 = vmatpush3.bf16.msra.mxu0 %v992_v49 }
 0x4c9   :  { %3246 = vmatprep.subr.bf16.mxu0 %v3557_v39  ;;  %v1385_v45 = vpop.permute.xlu1 %1384 }
 0x4cc   :  { %3247 = vmatpush3.bf16.msra.mxu0 %v993_v48 }
 0x4cd   :  { %3260 = vmatprep.subr.bf16.mxu0 %v3557_v39  ;;  %v4054_v46 = vpop.permute.xlu1 %1412 }
 0x4cf   :  { %3249 = vmatmul.mubr.msk.bf16.vlgmr.msra.gmra.mrb[20].mxu0 %vm247_vm0, %v991_v16 }
 0x4d0   :  { %3261 = vmatpush3.bf16.msra.mxu0 %v3910_v42  ;;  %3264 = vmatprep.mubr.msk.bf16.mxu0 %vm3558_vm5, %v3557_v39 }
 0x4d1   :  { %3262 = vmatprep.subr.bf16.mxu0 %v3557_v39  ;;  %v4056_v47 = vpop.permute.xlu1 %1422 }
 0x4d4   :  { %3263 = vmatpush3.bf16.msra.mxu0 %v3908_v40 }
 0x4d5   :  { %v4058_v48 = vpop.permute.xlu1 %1552 }
 0x4d7   :  { %3265 = vmatmul.mubr.msk.bf16.vlgmr.msra.gmra.mrb[24].mxu0 %vm247_vm0, %v1144_v14 }
 0x4d8   :  { %3280 = vmatprep.mubr.msk.bf16.mxu0 %vm247_vm0, %v3472_v5 }
 0x5a2   :  { %v1031_v51 = vpop.f32.mrb[20].mxu0 }
 0x5a3   :  { %v1038_v52 = vmul.f32 %v1031_v51, %v3918_v28  ;;  %v1044_v53 = vrot.slane %v1031_v51, 1  ;;  %v1053_v55 = vrot.slane %v1031_v51, 7  ;;  %v3250_v42 = vpop.f32.mrb[21].mxu0  ;;  %v1061_v56 = vmul.f32 %v1031_v51, %v563_v17 }
 0x5a4   :  { %v1068_v57 = vrot.slane %v1031_v51, 6  ;;  %v1076_v58 = vrot.slane %v1031_v51, 2  ;;  %v1034_v8 = vpop.f32.mrb[22].mxu0  ;;  %v1037_v6 = vmul.f32 %v1031_v51, %v3914_v50 }
 0x5a5   :  { %v1040_v40 = vrot.slane %v1038_v52, 1  ;;  %v1046_v7 = vmul.f32 %v1044_v53, %v3944_v61  ;;  %v1056_v9 = vmul.f32 %v1053_v55, %v3920_v31  ;;  %v3251_v36 = vpop.f32.mrb[23].mxu0  ;;  %v1071_v37 = vmul.f32 %v1044_v53, %v3918_v28 }
 0x5a6   :  { %v1078_v22 = vmul.f32 %v1076_v58, %v3946_v21  ;;  %v1055_v25 = vmul.f32 %v1053_v55, %v3914_v50  ;;  %v1070_v63 = vmul.f32 %v1068_v57, %v3914_v50  ;;  %v1063_v1 = vrot.slane %v1061_v56, 1 }
 0x5a7   :  { %v1042_v23 = vadd.f32 %v1040_v40, %v1037_v6  ;;  %v1048_v24 = vrot.slane %v1046_v7, 1  ;;  %v1058_v26 = vrot.slane %v1056_v9, 1  ;;  %v1073_v62 = vrot.slane %v1071_v37, 6  ;;  %v3473_v37 = vld [vmem:[%s4261_s30 + $0x8] sm:$0xff]  }
 0x5a8   :  { %v1080_v10 = vrot.slane %v1078_v22, 6  ;;  %v3474_v22 = vld [vmem:[%s4263_s12] sm:$0xff]  }
 0x5a9   :  { %v1060_v0 = vadd.f32 %v1058_v26, %v1055_v25  ;;  %v1050_v27 = vadd.f32 %v1048_v24, %v1042_v23  ;;  %v1075_v34 = vadd.f32 %v1073_v62, %v1070_v63 }
 0x5aa   :  { %v1226_v61 = vpop.f32.mrb[24].mxu0 }
 0x5ab   :  { %v1065_v31 = vadd.f32 %v1063_v1, %v1060_v0  ;;  %v3266_v19 = vpop.f32.mrb[25].mxu0  ;;  %v1082_v32 = vadd.f32 %v1080_v10, %v1075_v34  ;;  %v2940_v35 = vclamps-f32 %v1050_v27, 100.0 }
 0x5ac   :  { %v1229_v28 = vpop.f32.mrb[26].mxu0 }
 0x5ad   :  { %v2941_v21 = vclamps-f32 %v1065_v31, 100.0  ;;  %v3267_v38 = vpop.f32.mrb[27].mxu0  ;;  %v2942_v2 = vclamps-f32 %v1082_v32, 100.0  ;;  %v3475_v28 = vld [vmem:[%s4263_s12 + $0x8] sm:$0xff]  }
 0x5af   :  { %v1086_v4 = vsel %vm1085_vm10, %v2940_v35, %v2941_v21  ;;  %v3476_v21 = vld [vmem:[%s3604_s3 + $0x40] sm:$0xff]  }
 0x5b0   :  { %v1088_v50 = vsel %vm1087_vm11, %v1086_v4, %v2942_v2  ;;  %v4085_v2 = vld [vmem:[%s3569_s5] sm:$0xff] }
 0x5b1   :  { %v1089_v3 = vpack.c.bf16 %v1088_v50, %v1088_v50  ;;  %v1495_v4 = vmul.f32 2.0, %v4085_v2 }
 0x5b3   :  { %3257 = vmatmul.mubr.msk.bf16.vlgmr.msra.gmra.mrb[20].mxu1 %vm1090_vm12, %v1089_v3  ;;  %v4090_v3 = vld [vmem:[%s3569_s5 + $0x10] sm:$0xff] }
 0x5b4   :  { %3269 = vmatpush3.bf16.msk.msra.mxu1 %vm3995_vm9, %v3559_v20  ;;  %3272 = vmatprep.mubr.msk.bf16.mxu1 %vm1090_vm12, %v3980_v12  ;;  %v4060_v12 = vpop.permute.xlu1 %1580  ;;  %v1497_v5 = vmul.f32 2.0, %v4090_v3 }
 0x5b5   :  { %3416 = vmatprep.subr.msk.bf16.mxu1 %vm380_vm2, %v3999_v13 }
 0x5b8   :  { %3271 = vmatpush3.bf16.msra.mxu1 %v4010_v18  ;;  %v4062_v49 = vpop.permute.xlu1 %1562 }
 0x5bb   :  { %3273 = vmatmul.mubr.msk.bf16.vlgmr.msra.gmra.mrb[24].mxu1 %vm1090_vm12, %v3975_v29 }
 0x5bc   :  { %v4064_v16 = vpop.permute.xlu1 %1590  ;;  %3288 = vmatprep.mubr.msk.bf16.mxu1 %vm247_vm0, %v3474_v22 }
 0x5c0   :  { %v1183_v14 = vpop.permute.xlu1 %1182 }
 0x5c1   :  { %v1188_v29 = vrot.slane %v1183_v14, %v3923_v33  ;;  %v4095_v14 = vld [vmem:[%s3569_s5 + $0x8] sm:$0xff] }
 0x5c3   :  { %v1227_v17 = vadd.f32 %v1226_v61, %v1188_v29  ;;  %v1496_v29 = vmul.f32 2.0, %v4095_v14 }
 0x5c5   :  { %v1236_v42 = vrot.slane %v1227_v17, %v3923_v33 }
 0x686   :  { %v1131_v51 = vpop.f32.mrb[20].mxu1 }
 0x687   :  { %v1143_v52 = vmul.f32 %v2946_v15, %v1131_v51  ;;  %v3258_v53 = vpop.f32.mrb[21].mxu1 }
 0x688   :  { %v1134_v55 = vpop.f32.mrb[22].mxu1  ;;  %v4099_v53 = vld [vmem:[%s3569_s5 + $0x18] sm:$0xff]  ;;  %s4264_s5 = sld [smem:[#allocation18_spill]] }
 0x689   :  { %v1232_v56 = vadd.f32 %v1143_v52, %v3847_v60  ;;  %v3259_v57 = vpop.f32.mrb[23].mxu1  ;;  %v1380_v60 = vpop.permute.xlu0 %1379  ;;  %v1498_v55 = vmul.f32 2.0, %v4099_v53 }
 0x68b   :  { %v4070_v58 = vadd.f32 %v1236_v42, %v1232_v56 }
 0x68d   :  { %v1390_v26 = vpop.permute.xlu0 %1389 }
 0x68e   :  { %v3274_v8 = vpop.f32.mrb[24].mxu1 }
 0x68f   :  { %v1278_v6 = vpop.f32.mrb[25].mxu1 }
 0x690   :  { %v3275_v40 = vpop.f32.mrb[26].mxu1 }
 0x691   :  { %v1298_v7 = vpack.c.bf16 %v3275_v40, %v3274_v8  ;;  %v1281_v9 = vpop.f32.mrb[27].mxu1  ;;  %v1418_v35 = vpop.permute.xlu0 %1417 }
 0x692   :  { %v1297_v36 = vpack.c.bf16 %v1281_v9, %v1278_v6 }
 0x694   :  { %3276 = vmatprep.subr.bf16.mxu0 %v1297_v36 }
 0x695   :  { %3277 = vmatpush3.bf16.msra.mxu0 %v1297_v36  ;;  %v1428_v15 = vpop.permute.xlu0 %1427 }
 0x696   :  { %3278 = vmatprep.subr.bf16.mxu0 %v1298_v7 }
 0x699   :  { %3279 = vmatpush3.bf16.msra.mxu0 %v1298_v7 }
 0x69c   :  { %3281 = vmatmul.mubr.msk.bf16.vlgmr.msra.gmra.mrb[12].mxu0 %vm247_vm0, %v3473_v37 }
 0x69d   :  { %3296 = vmatprep.mubr.msk.bf16.mxu0 %vm247_vm0, %v3476_v21 }
 0x76f   :  { %v3282_v23 = vpop.f32.mrb[12].mxu0 }
 0x770   :  { %v1394_v24 = vadd.f32 %v3282_v23, %v1385_v45  ;;  %v1349_v25 = vpop.f32.mrb[13].mxu0 }
 0x771   :  { %v1392_v63 = vadd.f32 %v1375_v43, %v1349_v25  ;;  %v3283_v62 = vpop.f32.mrb[14].mxu0 }
 0x772   :  { %v1395_v0 = vadd.f32 %v3283_v62, %v1390_v26  ;;  %v1352_v1 = vpop.f32.mrb[15].mxu0  ;;  %v1398_v10 = vmax.f32 %v1394_v24, 0.0 }
 0x773   :  { %v1393_v27 = vadd.f32 %v1380_v60, %v1352_v1  ;;  %v1396_v34 = vmax.f32 %v1392_v63, 0.0 }
 0x774   :  { %v1399_v61 = vmax.f32 %v1395_v0, 0.0 }
 0x775   :  { %v1397_v31 = vmax.f32 %v1393_v27, 0.0 }
 0x776   :  { %v1405_v19 = vpack.c.bf16 %v1399_v61, %v1398_v10 }
 0x777   :  { %v1404_v32 = vpack.c.bf16 %v1397_v31, %v1396_v34 }
 0x779   :  { %3284 = vmatprep.subr.bf16.mxu1 %v1404_v32 }
 0x77a   :  { %3285 = vmatpush3.bf16.msra.mxu1 %v1404_v32 }
 0x77b   :  { %3286 = vmatprep.subr.bf16.mxu1 %v1405_v19 }
 0x77e   :  { %3287 = vmatpush3.bf16.msra.mxu1 %v1405_v19 }
 0x77f   :  { %3417 = vmatprep.subr.msk.bf16.mxu1 %vm380_vm2, %v3761_v41 }
 0x781   :  { %3289 = vmatmul.mubr.msk.bf16.vlgmr.msra.gmra.mrb[28].mxu1 %vm247_vm0, %v3475_v28 }
 0x782   :  { %3313 = vmatpush3.bf16.msra.mxu1 %v3767_v44 }
 0x783   :  { %3318 = vmatprep.subr.bf16.mxu1 %v3557_v39 }
 0x854   :  { %v3290_v38 = vpop.f32.mrb[28].mxu1 }
 0x855   :  { %v1480_v50 = vpop.f32.mrb[29].mxu1  ;;  %v1489_v41 = vadd.f32 %v3290_v38, %v4056_v47 }
 0x856   :  { %v1481_v43 = vadd.f32 %v1480_v50, %v4054_v46  ;;  %v3291_v45 = vpop.f32.mrb[30].mxu1 }
 0x857   :  { %v1483_v17 = vpop.f32.mrb[31].mxu1  ;;  %v1492_v52 = vadd.f32 %v3291_v45, %v1428_v15  ;;  %v1501_v42 = vadd.f32 %v1497_v5, %v1489_v41 }
 0x858   :  { %v1499_v51 = vadd.f32 %v1495_v4, %v1481_v43  ;;  %v1484_v47 = vadd.f32 %v1483_v17, %v1418_v35 }
 0x859   :  { %v1502_v8 = vadd.f32 %v1498_v55, %v1492_v52  ;;  %v1506_v40 = vsel %vm373_vm4, %v1501_v42, 0.0 }
 0x85a   :  { %v1500_v56 = vadd.f32 %v1496_v29, %v1484_v47  ;;  %v1503_v57 = vsel %vm373_vm4, %v1499_v51, 0.0  ;;  %v1558_v29 = vpop.permute.xlu0 %1557 }
 0x85b   :  { %v1508_v9 = vsel %vm373_vm4, %v1502_v8, 0.0 }
 0x85c   :  { %v1504_v46 = vsel %vm373_vm4, %v1500_v56, 0.0 }
 0x85d   :  { %v1505_v6 = vadd.f32 %v1504_v46, %v1503_v57 }
 0x85f   :  { %v1507_v7 = vadd.f32 %v1506_v40, %v1505_v6 }
 0x861   :  { %v1509_v36 = vadd.f32 %v1508_v9, %v1507_v7 }
 0x863   :  { %v1510_v37 = vrot.slane %v1509_v36, 4 }
 0x865   :  { %v1511_v22 = vadd.f32 %v1510_v37, %v1509_v36 }
 0x867   :  { %v1512_v60 = vrot.slane %v1511_v22, 2 }
 0x869   :  { %v1513_v23 = vadd.f32 %v1512_v60, %v1511_v22 }
 0x86b   :  { %v1514_v24 = vrot.slane %v1513_v23, 1 }
 0x86d   :  { %v1515_v25 = vadd.f32 %v1514_v24, %v1513_v23  ;;  %v3478_v24 = vld [vmem:[%s3604_s3 + $0x50] sm:$0xff]  }
 0x86f   :  { %v1517_v26 = vmul.f32 0.03125, %v1515_v25 }
 0x871   :  { %v1518_v63 = vsub.f32 %v1499_v51, %v1517_v26  ;;  %v1519_v62 = vsub.f32 %v1500_v56, %v1517_v26  ;;  %v1520_v0 = vsub.f32 %v1501_v42, %v1517_v26  ;;  %v1521_v1 = vsub.f32 %v1502_v8, %v1517_v26  ;;  %v1586_v51 = vpop.permute.xlu0 %1585 }
 0x873   :  { %v1522_v27 = vmul.f32 %v1518_v63, %v1518_v63  ;;  %v1523_v10 = vmul.f32 %v1519_v62, %v1519_v62  ;;  %v1524_v61 = vmul.f32 %v1520_v0, %v1520_v0  ;;  %v1525_v34 = vmul.f32 %v1521_v1, %v1521_v1 }
 0x875   :  { %v1526_v31 = vsel %vm373_vm4, %v1522_v27, 0.0  ;;  %v1527_v19 = vsel %vm373_vm4, %v1523_v10, 0.0  ;;  %v1529_v28 = vsel %vm373_vm4, %v1524_v61, 0.0  ;;  %v1531_v35 = vsel %vm373_vm4, %v1525_v34, 0.0  ;;  %v1568_v52 = vpop.permute.xlu0 %1567 }
 0x876   :  { %v1528_v32 = vadd.f32 %v1527_v19, %v1526_v31  ;;  %v1841_v31 = vpack.c.bf16 %v4070_v58, %v4070_v58  ;;  %v3480_v58 = vld [vmem:[%s3604_s3 + $0x60] sm:$0xff]   ;;  %v3481_v19 = vld [vmem:[%s3604_s3 + $0x68] sm:$0xff]  }
 0x878   :  { %v1530_v21 = vadd.f32 %v1529_v28, %v1528_v32  ;;  %v3483_v32 = vld [vmem:[%s3604_s3 + $0x78] sm:$0xff]  }
 0x879   :  { %v1596_v7 = vpop.permute.xlu0 %1595 }
 0x87a   :  { %v1532_v38 = vadd.f32 %v1531_v35, %v1530_v21 }
 0x87c   :  { %v1533_v4 = vrot.slane %v1532_v38, 4 }
 0x87e   :  { %v1534_v50 = vadd.f32 %v1533_v4, %v1532_v38  ;;  %v2002_v38 = vpop.permute.xlu1 %2001  ;;  %v1997_v4 = vpop.permute.xlu0 %1996 }
 0x880   :  { %v1535_v41 = vrot.slane %v1534_v50, 2 }
 0x882   :  { %v1536_v5 = vadd.f32 %v1535_v41, %v1534_v50 }
 0x884   :  { %v1537_v43 = vrot.slane %v1536_v5, 1 }
 0x886   :  { %v1538_v45 = vadd.f32 %v1537_v43, %v1536_v5 }
 0x888   :  { %v1539_v15 = vmul.f32 0.03125, %v1538_v45  ;;  %v2012_v45 = vpop.permute.xlu1 %2011 }
 0x88a   :  { %v1540_v17 = vadd.f32 1e-05, %v1539_v15 }
 0x88c   :  { %3494 = vrsqrt.f32 %v1540_v17  ;;  %v2007_v17 = vpop.permute.xlu0 %2006 }
 0x896   :  { %v3495_v55 = vpop.eup %3494 }
 0x897   :  { %v1543_v47 = vmul.f32 %v3495_v55, %v1519_v62  ;;  %v1542_v42 = vmul.f32 %v3495_v55, %v1518_v63  ;;  %v1544_v56 = vmul.f32 %v3495_v55, %v1520_v0  ;;  %v1545_v57 = vmul.f32 %v3495_v55, %v1521_v1 }
 0x899   :  { %v1571_v8 = vmul.f32 %v1558_v29, %v1543_v47  ;;  %v1570_v46 = vmul.f32 %v4058_v48, %v1542_v42  ;;  %v1572_v6 = vmul.f32 %v4062_v49, %v1544_v56  ;;  %v1573_v40 = vmul.f32 %v1568_v52, %v1545_v57  ;;  %v2039_v42 = vpop.permute.xlu1 %2038 }
 0x89b   :  { %v1598_v9 = vadd.f32 %v4060_v12, %v1570_v46  ;;  %v1599_v36 = vadd.f32 %v1586_v51, %v1571_v8  ;;  %v1600_v37 = vadd.f32 %v4064_v16, %v1572_v6  ;;  %v1601_v22 = vadd.f32 %v1596_v7, %v1573_v40  ;;  %v2034_v8 = vpop.permute.xlu0 %2033 }
 0x89d   :  { %v4115_v60 = vadd.f32 %v4085_v2, %v1598_v9  ;;  %v4118_v23 = vadd.f32 %v4095_v14, %v1599_v36  ;;  %v4121_v48 = vadd.f32 %v4090_v3, %v1600_v37  ;;  %v4124_v49 = vadd.f32 %v4099_v53, %v1601_v22  ;;  %v3477_v2 = vld [vmem:[%s3604_s3 + $0x48] sm:$0xff]   ;;  %v3479_v3 = vld [vmem:[%s3604_s3 + $0x58] sm:$0xff]  }
 0x89f   :  { %v1623_v12 = vpack.c.bf16 %v4118_v23, %v4115_v60  ;;  %v1624_v16 = vpack.c.bf16 %v4124_v49, %v4121_v48 }
 0x8a1   :  { %3292 = vmatprep.subr.bf16.mxu0 %v1623_v12 }
 0x8a2   :  { %3293 = vmatpush3.bf16.msra.mxu0 %v1623_v12 }
 0x8a3   :  { %3294 = vmatprep.subr.bf16.mxu0 %v1624_v16 }
 0x8a6   :  { %3295 = vmatpush3.bf16.msra.mxu0 %v1624_v16 }
 0x8a9   :  { %3297 = vmatmul.mubr.msk.bf16.vlgmr.msra.gmra.mrb[28].mxu0 %vm247_vm0, %v3477_v2 }
 0x8aa   :  { %3300 = vmatprep.mubr.msk.bf16.mxu0 %vm247_vm0, %v3478_v24  ;;  %v2049_v24 = vpop.permute.xlu1 %2048 }
 0x8b1   :  { %3301 = vmatmul.mubr.msk.bf16.gmra.mrb[32].mxu0 %vm247_vm0, %v3479_v3  ;;  %v2044_v3 = vpop.permute.xlu0 %2043 }
 0x8b2   :  { %3304 = vmatprep.mubr.msk.bf16.mxu0 %vm247_vm0, %v3480_v58 }
 0x8b9   :  { %3305 = vmatmul.mubr.msk.bf16.gmra.mrb[36].mxu0 %vm247_vm0, %v3481_v19 }
 0x97c   :  { %v3298_v14 = vpop.f32.mrb[28].mxu0 }
 0x97d   :  { %v1723_v53 = vpop.f32.mrb[29].mxu0 }
 0x97e   :  { %v3299_v25 = vpop.f32.mrb[30].mxu0 }
 0x97f   :  { %v1783_v26 = vpack.c.bf16 %v3299_v25, %v3298_v14  ;;  %v1726_v63 = vpop.f32.mrb[31].mxu0 }
 0x980   :  { %v1782_v62 = vpack.c.bf16 %v1726_v63, %v1723_v53 }
 0x984   :  { %v3302_v0 = vpop.f32.mrb[32].mxu0 }
 0x985   :  { %v1739_v1 = vpop.f32.mrb[33].mxu0 }
 0x986   :  { %v3303_v27 = vpop.f32.mrb[34].mxu0 }
 0x987   :  { %v1785_v10 = vpack.c.bf16 %v3303_v27, %v3302_v0  ;;  %v1742_v61 = vpop.f32.mrb[35].mxu0 }
 0x988   :  { %v1784_v34 = vpack.c.bf16 %v1742_v61, %v1739_v1  ;;  %v3485_v61 = vld [vmem:[%s4254_s13 + $0x18] sm:$0xff]  }
 0x98a   :  { %3314 = vmatprep.mubr.msk.bf16.mxu1 %vm373_vm4, %v1784_v34 }
 0x98b   :  { %3315 = vmatmul.mubr.msk.bf16.vlgmr.msra.gmra.mrb[32].mxu1 %vm373_vm4, %v1785_v10 }
 0x98c   :  { %3319 = vmatpush3.bf16.msra.mxu1 %v3839_v59  ;;  %3320 = vmatprep.mubr.msk.bf16.mxu1 %vm3558_vm5, %v3557_v39  ;;  %v3306_v34 = vpop.f32.mrb[36].mxu0 }
 0x98d   :  { %3324 = vmatprep.subr.bf16.mxu1 %v3557_v39 }
 0x993   :  { %3321 = vmatmul.mubr.msk.bf16.vlgmr.msra.gmra.mrb[36].mxu1 %vm373_vm4, %v1841_v31 }
 0x994   :  { %3325 = vmatpush3.bf16.msra.mxu1 %v3767_v44  ;;  %3326 = vmatprep.mubr.msk.bf16.mxu1 %vm3558_vm5, %v3557_v39  ;;  %v3482_v44 = vld [vmem:[%s3604_s3 + $0x70] sm:$0xff]   ;;  %s3560_s3 = smov [#allocation3]  }
 0x995   :  { %3418 = vmatprep.subr.msk.bf16.mxu1 %vm380_vm2, %v3835_v54  ;;  %3308 = vmatprep.mubr.msk.bf16.mxu0 %vm247_vm0, %v3482_v44  ;;  %v3484_v54 = vld [vmem:[%s4254_s13 + $0x10] sm:$0xff]   ;;  %s2859_s20 = sshll.u32 %s3560_s3, 4  ;;  %s2860_s20 = int_to_ptr.vmem [resolvable:$true] %s2859_s20 }
 0x996   :  { %3309 = vmatmul.mubr.msk.bf16.gmra.mrb[40].mxu0 %vm247_vm0, %v3483_v32  ;;  %v3486_v44 = vld [vmem:[%s4255_s8 + $0x10] sm:$0xff]   ;;  %v2074_v32 = vpop.permute.xlu0 %2073  ;;  %s3502_s27 = scalar_lea.vmem %s2860_s20, 16  ;;  %s3506_s4 = scalar_lea.vmem %s2860_s20, 32 }
 0x997   :  { %3340 = vmatprep.mubr.msk.bf16.mxu0 %vm247_vm0, %v3484_v54  ;;  %v2079_v54 = vpop.permute.xlu1 %2078  ;;  %p3503_p0 = scmp.ne.s32.totalorder %s2860_s20, %s3502_s27  ;;  %p3507_p1 = scmp.lt.s32.totalorder %s2860_s20, %s2860_s20 }
 0x998   :  { %p3508_p2 = scmp.lt.s32.totalorder %s3506_s4, %s3502_s27 }
 0x99a   :  { %p3509_p3 = por %p3508_p2, %p3507_p1 }
 0x99b   :  { %3327 = vmatmul.mubr.msk.bf16.vlgmr.msra.gmra.mrb[40].mxu1 %vm373_vm4, %v1841_v31  ;;  %v1755_v31 = vpop.f32.mrb[37].mxu0  ;;  %v2089_v11 = vpop.permute.xlu1 %2088 }
 0x99c   :  { %3332 = vmatprep.mubr.msk.bf16.mxu1 %vm373_vm4, %v1782_v62  ;;  %3331 = vmatpush3.bf16.msra.mxu1 %v3839_v59  ;;  %v3307_v58 = vpop.f32.mrb[38].mxu0  ;;  %p3510_p4 = pnand %p3509_p3, %p3503_p0 }
 0x99d   :  { %v1757_v19 = vpop.f32.mrb[39].mxu0 }
 0x9a3   :  { %3333 = vmatmul.mubr.msk.bf16.vlgmr.msra.gmra.mrb[32].mxu1 %vm373_vm4, %v1783_v26 }
 0x9a4   :  { %3348 = vmatprep.mubr.msk.bf16.mxu1 %vm247_vm0, %v3486_v44 }
 0xa66   :  { %v1879_v28 = vpop.f32.mrb[36].mxu1 }
 0xa67   :  { %v3322_v21 = vpop.f32.mrb[37].mxu1 }
 0xa68   :  { %v1882_v59 = vpop.f32.mrb[38].mxu1 }
 0xa69   :  { %v3323_v35 = vpop.f32.mrb[39].mxu1 }
 0xa6e   :  { %v1919_v50 = vpop.f32.mrb[40].mxu1 }
 0xa6f   :  { %v1925_v41 = vsub.f32 %v1879_v28, %v1919_v50  ;;  %v3328_v5 = vpop.f32.mrb[41].mxu1  ;;  %v2084_v28 = vpop.permute.xlu0 %2083 }
 0xa70   :  { %v1922_v43 = vpop.f32.mrb[42].mxu1 }
 0xa71   :  { %v1926_v29 = vmul.f32 %v1925_v41, %v1925_v41  ;;  %v3329_v15 = vpop.f32.mrb[43].mxu1 }
 0xa72   :  { %v3487_v15 = vld [vmem:[%s4255_s8 + $0x18] sm:$0xff]  }
 0xa73   :  { %v1928_v51 = vrot.slane %v1926_v29, 1  ;;  %v1931_v55 = vrot.slane %v1926_v29, 2 }
 0xa75   :  { %v1930_v52 = vadd.f32 %v1928_v51, %v1926_v29  ;;  %v2180_v51 = vpop.permute.xlu1 %2179 }
 0xa76   :  { %v3334_v47 = vpop.f32.mrb[32].mxu1 }
 0xa77   :  { %v1933_v56 = vadd.f32 %v1931_v55, %v1930_v52  ;;  %v1974_v57 = vpop.f32.mrb[33].mxu1 }
 0xa78   :  { %v3335_v46 = vpop.f32.mrb[34].mxu1 }
 0xa79   :  { %v2017_v6 = vrot.slane %v1933_v56, %v3923_v33  ;;  %v1977_v40 = vpop.f32.mrb[35].mxu1  ;;  %v2190_v56 = vpop.permute.xlu1 %2189 }
 0xa7b   :  { %v2020_v7 = vmul.f32 %v2017_v6, %v2007_v17  ;;  %v2018_v9 = vmul.f32 %v2017_v6, %v1997_v4  ;;  %v2021_v36 = vmul.f32 %v2017_v6, %v2012_v45  ;;  %v2019_v37 = vmul.f32 %v2017_v6, %v2002_v38  ;;  %v2175_v17 = vpop.permute.xlu0 %2174 }
 0xa7d   :  { %v2024_v22 = vadd.f32 %v3334_v47, %v2020_v7  ;;  %v2022_v12 = vadd.f32 %v2018_v9, %v1974_v57  ;;  %v2025_v16 = vadd.f32 %v3335_v46, %v2021_v36  ;;  %v2023_v2 = vadd.f32 %v2019_v37, %v1977_v40 }
 0xa7f   :  { %v2053_v14 = vadd.f32 %v2044_v3, %v2024_v22  ;;  %v2051_v53 = vadd.f32 %v2034_v8, %v2022_v12  ;;  %v2054_v25 = vadd.f32 %v2049_v24, %v2025_v16  ;;  %v2052_v26 = vadd.f32 %v2039_v42, %v2023_v2  ;;  %v2185_v52 = vpop.permute.xlu0 %2184  ;;  %v3488_v16 = vld [vmem:[%s4261_s30 + $0x10] sm:$0xff]  }
 0xa81   :  { %v2057_v63 = vmax.f32 %v2053_v14, 0.0  ;;  %v2055_v62 = vmax.f32 %v2051_v53, 0.0  ;;  %v2058_v0 = vmax.f32 %v2054_v25, 0.0  ;;  %v2056_v1 = vmax.f32 %v2052_v26, 0.0  ;;  %v3489_v26 = vld [vmem:[%s4261_s30 + $0x18] sm:$0xff]  }
 0xa83   :  { %v2064_v27 = vpack.c.bf16 %v2056_v1, %v2055_v62  ;;  %v2065_v10 = vpack.c.bf16 %v2058_v0, %v2057_v63  ;;  %v3490_v63 = vld [vmem:[%s4263_s12 + $0x10] sm:$0xff]   ;;  %v2402_v62 = vpop.permute.xlu0 %2401 }
 0xa85   :  { %3336 = vmatprep.subr.bf16.mxu0 %v2064_v27 }
 0xa86   :  { %3337 = vmatpush3.bf16.msra.mxu0 %v2064_v27 }
 0xa87   :  { %3338 = vmatprep.subr.bf16.mxu0 %v2065_v10  ;;  %v2412_v0 = vpop.permute.xlu0 %2411 }
 0xa8a   :  { %3339 = vmatpush3.bf16.msra.mxu0 %v2065_v10  ;;  %v2407_v10 = vpop.permute.xlu1 %2406 }
 0xa8b   :  { %3352 = vmatprep.subr.msk.bf16.mxu0 %vm3995_vm9, %v3559_v20  ;;  %v2442_v1 = vpop.permute.xlu0 %2441 }
 0xa8d   :  { %3341 = vmatmul.mubr.msk.bf16.vlgmr.msra.gmra.mrb[44].mxu0 %vm247_vm0, %v3485_v61 }
 0xa8e   :  { %3353 = vmatpush3.bf16.msk.msra.mxu0 %vm3995_vm9, %v3559_v20  ;;  %v2417_v19 = vpop.permute.xlu1 %2416 }
 0xa8f   :  { %3419 = vmatprep.subr.msk.bf16.mxu0 %vm380_vm2, %v3999_v13  ;;  %v2452_v27 = vpop.permute.xlu0 %2451 }
 0xa92   :  { %3355 = vmatpush3.bf16.msra.mxu0 %v4010_v18 }
 0xa93   :  { %v4188_v34 = vpop.permute.xlu0 %2581 }
 0xb60   :  { %v3342_v21 = vpop.f32.mrb[44].mxu0 }
 0xb61   :  { %v2150_v59 = vadd.f32 %v3342_v21, %v2084_v28  ;;  %v2141_v35 = vpop.f32.mrb[45].mxu0 }
 0xb62   :  { %v2142_v20 = vadd.f32 %v2141_v35, %v2074_v32  ;;  %v3343_v38 = vpop.f32.mrb[46].mxu0 }
 0xb63   :  { %v2153_v13 = vadd.f32 %v3343_v38, %v2089_v11  ;;  %v2144_v4 = vpop.f32.mrb[47].mxu0  ;;  %v2158_v50 = vmax.f32 %v2150_v59, 0.0  ;;  %v178_v38 = vpop.permute.xlu0 %177 }
 0xb64   :  { %v2145_v18 = vadd.f32 %v2144_v4, %v2079_v54  ;;  %v2156_v5 = vmax.f32 %v2142_v20, 0.0  ;;  %vm179_vm13 = vcmp.eq.s32.totalorder %v3978_v30, %v178_v38 }
 0xb65   :  { %v2159_v41 = vmax.f32 %v2153_v13, 0.0 }
 0xb66   :  { %v2157_v43 = vmax.f32 %v2145_v18, 0.0  ;;  %v2904_v18 = vsel %vm179_vm13, 1.0, %v3557_v39 }
 0xb67   :  { %v2166_v45 = vpack.c.bf16 %v2159_v41, %v2158_v50  ;;  %v182_v50 = vpack.c.bf16 %v2904_v18, %v2904_v18  ;;  %v3491_v41 = vld [vmem:[%s4263_s12 + $0x18] sm:$0xff]  }
 0xb68   :  { %v2165_v29 = vpack.c.bf16 %v2157_v43, %v2156_v5  ;;  %v2447_v43 = vpop.permute.xlu1 %2446 }
 0xb69   :  { %v2645_v5 = vsel %vm380_vm2, %v182_v50, 0 }
 0xb6a   :  { %3344 = vmatprep.subr.bf16.mxu1 %v2165_v29 }
 0xb6b   :  { %3345 = vmatpush3.bf16.msra.mxu1 %v2165_v29 }
 0xb6c   :  { %3346 = vmatprep.subr.bf16.mxu1 %v2166_v45 }
 0xb6f   :  { %3347 = vmatpush3.bf16.msra.mxu1 %v2166_v45 }
 0xb72   :  { %3349 = vmatmul.mubr.msk.bf16.vlgmr.msra.gmra.mrb[44].mxu1 %vm247_vm0, %v3487_v15 }
 0xb73   :  { %3372 = vmatprep.mubr.msk.bf16.mxu1 %vm247_vm0, %v3490_v63 }
 0xc45   :  { %v3350_v55 = vpop.f32.mrb[44].mxu1 }
 0xc46   :  { %v2251_v47 = vadd.f32 %v3350_v55, %v2185_v52  ;;  %v2242_v42 = vpop.f32.mrb[45].mxu1  ;;  %v2457_v52 = vpop.permute.xlu1 %2456  ;;  %v2526_v55 = vmul.f32 2.0, %v4121_v48 }
 0xc47   :  { %v2243_v57 = vadd.f32 %v2242_v42, %v2175_v17  ;;  %v3351_v8 = vpop.f32.mrb[46].mxu1  ;;  %v2524_v17 = vmul.f32 2.0, %v4115_v60 }
 0xc48   :  { %v2254_v46 = vadd.f32 %v3351_v8, %v2190_v56  ;;  %v2245_v6 = vpop.f32.mrb[47].mxu1  ;;  %v2259_v7 = vmax.f32 %v2251_v47, 0.0  ;;  %v2525_v8 = vmul.f32 2.0, %v4118_v23 }
 0xc49   :  { %v2246_v40 = vadd.f32 %v2245_v6, %v2180_v51  ;;  %v2257_v36 = vmax.f32 %v2243_v57, 0.0  ;;  %v2527_v6 = vmul.f32 2.0, %v4124_v49 }
 0xc4a   :  { %v2260_v9 = vmax.f32 %v2254_v46, 0.0  ;;  %v2587_v18 = vpop.permute.xlu1 %2586 }
 0xc4b   :  { %v2258_v37 = vmax.f32 %v2246_v40, 0.0 }
 0xc4c   :  { %v2262_v22 = vpack.c.bf16 %v2260_v9, %v2259_v7 }
 0xc4d   :  { %v2261_v12 = vpack.c.bf16 %v2258_v37, %v2257_v36 }
 0xc4f   :  { %3356 = vmatprep.mubr.msk.bf16.mxu0 %vm1090_vm12, %v2261_v12 }
 0xc50   :  { %3357 = vmatmul.mubr.msk.bf16.vlgmr.msra.gmra.mrb[48].mxu0 %vm1090_vm12, %v2262_v22 }
 0xc51   :  { %3364 = vmatprep.mubr.msk.bf16.mxu0 %vm247_vm0, %v3488_v16 }
 0xd23   :  { %v3358_v2 = vpop.f32.mrb[48].mxu0 }
 0xd24   :  { %v2303_v24 = vpop.f32.mrb[49].mxu0 }
 0xd25   :  { %v3359_v3 = vpop.f32.mrb[50].mxu0 }
 0xd26   :  { %v2324_v14 = vpack.c.bf16 %v3359_v3, %v3358_v2  ;;  %v2306_v53 = vpop.f32.mrb[51].mxu0 }
 0xd27   :  { %v2323_v25 = vpack.c.bf16 %v2306_v53, %v2303_v24 }
 0xd29   :  { %3360 = vmatprep.subr.bf16.mxu0 %v2323_v25 }
 0xd2a   :  { %3361 = vmatpush3.bf16.msra.mxu0 %v2323_v25 }
 0xd2b   :  { %3362 = vmatprep.subr.bf16.mxu0 %v2324_v14 }
 0xd2e   :  { %3363 = vmatpush3.bf16.msra.mxu0 %v2324_v14 }
 0xd31   :  { %3365 = vmatmul.mubr.msk.bf16.vlgmr.msra.gmra.mrb[40].mxu0 %vm247_vm0, %v3489_v26 }
 0xe04   :  { %v3366_v61 = vpop.f32.mrb[40].mxu0 }
 0xe05   :  { %v2421_v31 = vadd.f32 %v3366_v61, %v2412_v0  ;;  %v2375_v58 = vpop.f32.mrb[41].mxu0 }
 0xe06   :  { %v2419_v44 = vadd.f32 %v2402_v62, %v2375_v58  ;;  %v3367_v32 = vpop.f32.mrb[42].mxu0 }
 0xe07   :  { %v2422_v54 = vadd.f32 %v3367_v32, %v2417_v19  ;;  %v2378_v28 = vpop.f32.mrb[43].mxu0  ;;  %v2425_v59 = vmax.f32 %v2421_v31, 0.0 }
 0xe08   :  { %v2420_v21 = vadd.f32 %v2407_v10, %v2378_v28  ;;  %v2423_v11 = vmax.f32 %v2419_v44, 0.0 }
 0xe09   :  { %v2426_v35 = vmax.f32 %v2422_v54, 0.0 }
 0xe0a   :  { %v2424_v20 = vmax.f32 %v2420_v21, 0.0 }
 0xe0b   :  { %v2433_v13 = vpack.c.bf16 %v2426_v35, %v2425_v59 }
 0xe0c   :  { %v2432_v4 = vpack.c.bf16 %v2424_v20, %v2423_v11 }
 0xe0e   :  { %3368 = vmatprep.subr.bf16.mxu1 %v2432_v4 }
 0xe0f   :  { %3369 = vmatpush3.bf16.msra.mxu1 %v2432_v4 }
 0xe10   :  { %3370 = vmatprep.subr.bf16.mxu1 %v2433_v13 }
 0xe13   :  { %3371 = vmatpush3.bf16.msra.mxu1 %v2433_v13 }
 0xe14   :  { %3420 = vmatprep.subr.msk.bf16.mxu1 %vm380_vm2, %v182_v50 }
 0xe16   :  { %3373 = vmatmul.mubr.msk.bf16.vlgmr.msra.gmra.mrb[48].mxu1 %vm247_vm0, %v3491_v41 }
 0xe17   :  { %3377 = vmatpush3.bf16.msra.mxu1 %v2645_v5  ;;  %v2592_v5 = vpop.permute.xlu1 %2591 }
 0xe18   :  { %3390 = vmatprep.subr.bf16.mxu1 %v3557_v39 }
 0xee9   :  { %v3374_v30 = vpop.f32.mrb[48].mxu1 }
 0xeea   :  { %v2509_v45 = vpop.f32.mrb[49].mxu1  ;;  %v2518_v29 = vadd.f32 %v3374_v30, %v2452_v27  ;;  %v2611_v30 = vpop.permute.xlu1 %2610 }
 0xeeb   :  { %v2510_v15 = vadd.f32 %v2509_v45, %v2442_v1  ;;  %v3375_v51 = vpop.f32.mrb[50].mxu1 }
 0xeec   :  { %v2512_v47 = vpop.f32.mrb[51].mxu1  ;;  %v2521_v56 = vadd.f32 %v3375_v51, %v2457_v52  ;;  %v2530_v46 = vadd.f32 %v2526_v55, %v2518_v29 }
 0xeed   :  { %v2528_v42 = vadd.f32 %v2524_v17, %v2510_v15  ;;  %v2513_v57 = vadd.f32 %v2512_v47, %v2447_v43  ;;  %v2597_v43 = vpop.permute.xlu0 %2596 }
 0xeee   :  { %v2531_v9 = vadd.f32 %v2527_v6, %v2521_v56  ;;  %v2535_v22 = vsel %vm373_vm4, %v2530_v46, 0.0 }
 0xeef   :  { %v2529_v40 = vadd.f32 %v2525_v8, %v2513_v57  ;;  %v2532_v7 = vsel %vm373_vm4, %v2528_v42, 0.0  ;;  %v2621_v57 = vpop.permute.xlu1 %2620 }
 0xef0   :  { %v2537_v16 = vsel %vm373_vm4, %v2531_v9, 0.0 }
 0xef1   :  { %v2533_v36 = vsel %vm373_vm4, %v2529_v40, 0.0  ;;  %v2616_v45 = vpop.permute.xlu0 %2615 }
 0xef2   :  { %v2534_v37 = vadd.f32 %v2533_v36, %v2532_v7 }
 0xef4   :  { %v2536_v12 = vadd.f32 %v2535_v22, %v2534_v37 }
 0xef5   :  { %v2626_v8 = vpop.permute.xlu0 %2625 }
 0xef6   :  { %v2538_v2 = vadd.f32 %v2537_v16, %v2536_v12  ;;  %v3492_v16 = vld [vmem:[%s4264_s5] sm:$0xff]  }
 0xef7   :  { %3386 = vmatprep.mubr.msk.bf16.mxu0 %vm247_vm0, %v3492_v16 }
 0xef8   :  { %v2539_v24 = vrot.slane %v2538_v2, 4 }
 0xefa   :  { %v2540_v3 = vadd.f32 %v2539_v24, %v2538_v2 }
 0xefc   :  { %v2541_v14 = vrot.slane %v2540_v3, 2 }
 0xefe   :  { %v2542_v53 = vadd.f32 %v2541_v14, %v2540_v3  ;;  %v2709_v14 = vpop.permute.xlu1 %2708 }
 0xf00   :  { %v2543_v25 = vrot.slane %v2542_v53, 1 }
 0xf02   :  { %v2544_v26 = vadd.f32 %v2543_v25, %v2542_v53  ;;  %v2714_v53 = vpop.permute.xlu0 %2713  ;;  %v2719_v25 = vpop.permute.xlu1 %2718 }
 0xf04   :  { %v2545_v63 = vmul.f32 0.03125, %v2544_v26 }
 0xf06   :  { %v2546_v62 = vsub.f32 %v2528_v42, %v2545_v63  ;;  %v2547_v0 = vsub.f32 %v2529_v40, %v2545_v63  ;;  %v2548_v1 = vsub.f32 %v2530_v46, %v2545_v63  ;;  %v2549_v27 = vsub.f32 %v2531_v9, %v2545_v63 }
 0xf08   :  { %v2550_v10 = vmul.f32 %v2546_v62, %v2546_v62  ;;  %v2551_v61 = vmul.f32 %v2547_v0, %v2547_v0  ;;  %v2552_v31 = vmul.f32 %v2548_v1, %v2548_v1  ;;  %v2553_v58 = vmul.f32 %v2549_v27, %v2549_v27 }
 0xf0a   :  { %v2554_v19 = vsel %vm373_vm4, %v2550_v10, 0.0  ;;  %v2555_v44 = vsel %vm373_vm4, %v2551_v61, 0.0  ;;  %v2557_v54 = vsel %vm373_vm4, %v2552_v31, 0.0  ;;  %v2559_v21 = vsel %vm373_vm4, %v2553_v58, 0.0 }
 0xf0b   :  { %v2556_v32 = vadd.f32 %v2555_v44, %v2554_v19 }
 0xf0d   :  { %v2558_v28 = vadd.f32 %v2557_v54, %v2556_v32 }
 0xf0f   :  { %v2560_v59 = vadd.f32 %v2559_v21, %v2558_v28  ;;  %v2795_v21 = vld [vmem:[%s3709_s25] sm:$0x1] }
 0xf11   :  { %v2561_v35 = vrot.slane %v2560_v59, 4 }
 0xf13   :  { %v2562_v11 = vadd.f32 %v2561_v35, %v2560_v59  ;;  %v2802_v59 = vpop.permute.xlu1 %2801 }
 0xf14   :  { %v2807_v35 = vrot.slane %v2802_v59, %v3923_v33 }
 0xf15   :  { %v2563_v20 = vrot.slane %v2562_v11, 2 }
 0xf17   :  { %v2564_v38 = vadd.f32 %v2563_v20, %v2562_v11 }
 0xf19   :  { %v2565_v13 = vrot.slane %v2564_v38, 1 }
 0xf1b   :  { %v2566_v4 = vadd.f32 %v2565_v13, %v2564_v38 }
 0xf1d   :  { %v2567_v50 = vmul.f32 0.03125, %v2566_v4 }
 0xf1f   :  { %v2568_v41 = vadd.f32 1e-05, %v2567_v50 }
 0xf21   :  { %3496 = vrsqrt.f32 %v2568_v41 }
 0xf2b   :  { %v3497_v29 = vpop.eup %3496 }
 0xf2c   :  { %v2571_v15 = vmul.f32 %v3497_v29, %v2547_v0  ;;  %v2572_v17 = vmul.f32 %v3497_v29, %v2548_v1  ;;  %v2570_v51 = vmul.f32 %v3497_v29, %v2546_v62  ;;  %v2573_v52 = vmul.f32 %v3497_v29, %v2549_v27  ;;  %v2724_v0 = vpop.permute.xlu0 %2723 }
 0xf2e   :  { %v2600_v55 = vmul.f32 %v2587_v18, %v2571_v15  ;;  %v2599_v47 = vmul.f32 %v4188_v34, %v2570_v51  ;;  %v2601_v42 = vmul.f32 %v2592_v5, %v2572_v17  ;;  %v2602_v56 = vmul.f32 %v2597_v43, %v2573_v52 }
 0xf30   :  { %v2629_v46 = vadd.f32 %v2616_v45, %v2600_v55  ;;  %v2628_v6 = vadd.f32 %v2611_v30, %v2599_v47  ;;  %v2630_v40 = vadd.f32 %v2621_v57, %v2601_v42  ;;  %v2631_v7 = vadd.f32 %v2626_v8, %v2602_v56 }
 0xf32   :  { %v2632_v9 = vadd.f32 %v2628_v6, %v4115_v60  ;;  %v2633_v36 = vadd.f32 %v2629_v46, %v4118_v23  ;;  %v2634_v37 = vadd.f32 %v2630_v40, %v4121_v48  ;;  %v2635_v22 = vadd.f32 %v2631_v7, %v4124_v49  ;;  %v3493_v49 = vld [vmem:[%s4264_s5 + $0x8] sm:$0xff]  }
 0xf34   :  { %v2636_v12 = vpack.c.bf16 %v2633_v36, %v2632_v9  ;;  %v2637_v34 = vpack.c.bf16 %v2635_v22, %v2634_v37 }
 0xf36   :  { %3378 = vmatprep.mubr.msk.bf16.mxu1 %vm373_vm4, %v2636_v12 }
 0xf37   :  { %3379 = vmatmul.mubr.msk.bf16.vlgmr.msra.gmra.mrb[52].mxu1 %vm373_vm4, %v2637_v34 }
 0xf38   :  { %3394 = vmatprep.mubr.msk.bf16.mxu1 %vm3558_vm5, %v3557_v39 }
0x100a   :  { %v3380_v60 = vpop.f32.mrb[52].mxu1 }
0x100b   :  { %v2681_v2 = vpop.f32.mrb[53].mxu1 }
0x100c   :  { %v3381_v23 = vpop.f32.mrb[54].mxu1 }
0x100d   :  { %v2701_v24 = vpack.c.bf16 %v3381_v23, %v3380_v60  ;;  %v2684_v48 = vpop.f32.mrb[55].mxu1 }
0x100e   :  { %v2700_v3 = vpack.c.bf16 %v2684_v48, %v2681_v2 }
0x1010   :  { %3382 = vmatprep.subr.bf16.mxu0 %v2700_v3 }
0x1011   :  { %3383 = vmatpush3.bf16.msra.mxu0 %v2700_v3 }
0x1012   :  { %3384 = vmatprep.subr.bf16.mxu0 %v2701_v24 }
0x1015   :  { %3385 = vmatpush3.bf16.msra.mxu0 %v2701_v24 }
0x1018   :  { %3387 = vmatmul.mubr.msk.bf16.vlgmr.msra.gmra.mrb[52].mxu0 %vm247_vm0, %v3493_v49 }
0x10eb   :  { %v3388_v26 = vpop.f32.mrb[52].mxu0 }
0x10ec   :  { %v2785_v63 = vadd.f32 %v3388_v26, %v2719_v25  ;;  %v2776_v62 = vpop.f32.mrb[53].mxu0 }
0x10ed   :  { %v2777_v1 = vadd.f32 %v2776_v62, %v2709_v14  ;;  %v3389_v27 = vpop.f32.mrb[54].mxu0 }
0x10ee   :  { %v2788_v10 = vadd.f32 %v3389_v27, %v2724_v0  ;;  %v2779_v61 = vpop.f32.mrb[55].mxu0  ;;  %v2793_v58 = vmax.f32 %v2785_v63, 0.0 }
0x10ef   :  { %v2780_v31 = vadd.f32 %v2779_v61, %v2714_v53  ;;  %v2791_v44 = vmax.f32 %v2777_v1, 0.0 }
0x10f0   :  { %v2794_v19 = vmax.f32 %v2788_v10, 0.0 }
0x10f1   :  { %v2792_v32 = vmax.f32 %v2780_v31, 0.0 }
0x10f2   :  { %v2797_v54 = vpack.c.bf16 %v2794_v19, %v2793_v58 }
0x10f3   :  { %v2796_v28 = vpack.c.bf16 %v2792_v32, %v2791_v44 }
0x10f5   :  { %3391 = vmatpush3.bf16.msra.mxu1 %v2796_v28 }
0x10f6   :  { %3392 = vmatprep.subr.bf16.mxu1 %v3557_v39 }
0x10f9   :  { %3393 = vmatpush3.bf16.msra.mxu1 %v2797_v54 }
0x10fc   :  { %3395 = vmatmul.mubr.msk.bf16.vlgmr.msra.gmra.mrb[56].mxu1 %vm247_vm0, %v2795_v21 }
0x11cf   :  { %v2845_v11 = vpop.f32.mrb[56].mxu1 }
0x11d0   :  { %v2846_v20 = vadd.f32 %v2845_v11, %v2807_v35  ;;  %v3396_v38 = vpop.f32.mrb[57].mxu1 }
0x11d1   :  { %v2848_v13 = vpop.f32.mrb[58].mxu1 }
0x11d2   :  { %v3397_v4 = vpop.f32.mrb[59].mxu1  ;;  %2852 = vst.msk [vmem:[#allocation3] sm:$0x1] %vm2851_vm14, %v2846_v20 }
0x11d3   :  { %3513 = shalt.err (!%p3510_p4)
}
0x11d4   :  { %s3514_s25 = scalar_lea.hbm %s3717_s29, 16 }
0x11d5   :  { %p3515_p5 = scmp.ne.s32.totalorder %s3717_s29, %s3514_s25  ;;  %p3518_p6 = scmp.lt.u32.totalorder %s3514_s25, %s3717_s29 }
0x11d7   :  { %p3520_p7 = pnand %p3518_p6, %p3515_p5 }
0x11d9   :  { %3523 = shalt.err (!%p3520_p7)
}
0x11da   :  { %2862 = dma.vmem_to_hbm [thread:$0]  %s2860_s20, 16, %s3717_s29, [#allocation4]  }
0x11db   :  { %3524 = dma.done.wait [#allocation4], 16  }
0x11dc   :  { %3525 = vsyncadd [#allocation4], 4294967280 }
0x11dd   :  { %2866 = vsyncpa [#allocation4], 1 }

</bundles_post_ra>
